<compile_context>
chip_gen: v7x
topology: tpu7x:2x2x1
jax: 0.10.0
libtpu: 0.0.40
codegen_flags: <defaults>
</compile_context>

<pallas_src>
import functools
import math

import jax
import jax.numpy as jnp
from jax import lax
from jax.experimental import pallas as pl
from jax.experimental.pallas import tpu as pltpu

# ---------------- config (small synthetic BERT) ----------------
VOCAB = 100
TYPE_VOCAB = 2
MAX_POS = 16
HIDDEN = 32
NUM_HEADS = 4
INTERMEDIATE = 64
NUM_LAYERS = 2
NUM_LABELS = 3
LN_EPS = 1e-12


# ---------------- in-kernel helpers ----------------
def _layer_norm(x, gamma, beta, eps=LN_EPS):
    mu = jnp.mean(x, axis=-1, keepdims=True)
    var = jnp.mean((x - mu) ** 2, axis=-1, keepdims=True)
    return (x - mu) * lax.rsqrt(var + eps) * gamma + beta


def _gelu(x):
    # TODO(synk): PyTorch BERT uses exact erf-based GELU; tanh approximation used here.
    return 0.5 * x * (1.0 + jnp.tanh(0.7978845608028654 * (x + 0.044715 * x * x * x)))


# ---------------- fused Pallas kernel ----------------
def bert_fused_kernel(x_ref, amask_ref,
                      emb_g_ref, emb_b_ref,
                      wqkv_ref, bqkv_ref, wo_ref, bo_ref,
                      ln1_g_ref, ln1_b_ref,
                      wi_ref, bi_ref, wo2_ref, bo2_ref,
                      ln2_g_ref, ln2_b_ref,
                      wp_ref, bp_ref, wc_ref, bc_ref,
                      logits_ref, ctx_ref,
                      *, num_layers, num_heads, batch, seq):
    H = x_ref.shape[-1]
    hd = H // num_heads
    scale = 1.0 / math.sqrt(hd)

    # ---- embedding LayerNorm (fused prologue) ----
    x = _layer_norm(x_ref[...], emb_g_ref[...], emb_b_ref[...])      # (B*S, H)

    # ---- encoder layers: fori_loop over stacked weights, activation stays in vregs/VMEM ----
    def layer_body(l, x):
        # fused QKV projection on the flattened batch
        qkv = jnp.dot(x, wqkv_ref[l], preferred_element_type=jnp.float32) + bqkv_ref[l]
        q = qkv[:, 0 * H:1 * H]
        k = qkv[:, 1 * H:2 * H]
        v = qkv[:, 2 * H:3 * H]

        # per-(batch, head) scores + softmax; context written into VMEM scratch slab
        for b in range(batch):
            r0 = b * seq
            am = amask_ref[b]                                         # (1, S) additive mask
            for h in range(num_heads):
                c0 = h * hd
                qh = q[r0:r0 + seq, c0:c0 + hd]
                kh = k[r0:r0 + seq, c0:c0 + hd]
                vh = v[r0:r0 + seq, c0:c0 + hd]
                s = jnp.dot(qh, kh.T, preferred_element_type=jnp.float32) * scale + am
                m = jnp.max(s, axis=-1, keepdims=True)
                e = jnp.exp(s - m)
                inv = pl.reciprocal(jnp.sum(e, axis=-1, keepdims=True), approx=True)
                p = e * inv
                ctx_ref[r0:r0 + seq, c0:c0 + hd] = jnp.dot(
                    p, vh, preferred_element_type=jnp.float32)

        attn = jnp.dot(ctx_ref[...], wo_ref[l],
                       preferred_element_type=jnp.float32) + bo_ref[l]
        h1 = _layer_norm(x + attn, ln1_g_ref[l], ln1_b_ref[l])

        inter = _gelu(jnp.dot(h1, wi_ref[l],
                              preferred_element_type=jnp.float32) + bi_ref[l])
        ffn = jnp.dot(inter, wo2_ref[l],
                      preferred_element_type=jnp.float32) + bo2_ref[l]
        return _layer_norm(h1 + ffn, ln2_g_ref[l], ln2_b_ref[l])

    x = lax.fori_loop(0, num_layers, layer_body, x)

    # ---- classifier on [CLS] rows (fused epilogue, single narrow store) ----
    cls = jnp.concatenate([x[b * seq:b * seq + 1, :] for b in range(batch)], axis=0)  # (B, H)
    pooled = jnp.tanh(jnp.dot(cls, wp_ref[...],
                              preferred_element_type=jnp.float32) + bp_ref[...])
    logits_ref[...] = jnp.dot(pooled, wc_ref[...],
                              preferred_element_type=jnp.float32) + bc_ref[...]


# ---------------- wrapper ----------------
def bert_forward(params, input_ids, token_type_ids, mask=None):
    B, S = input_ids.shape
    if mask is None:
        mask = (input_ids != 0)                                       # _create_mask
    amask = ((1.0 - mask.astype(jnp.float32)) * -10000.0).reshape(B, 1, S)

    # embedding gather + adds stay in XLA (data-dependent gather); LN is fused into the kernel
    we = jnp.take(params['word_emb'], input_ids, axis=0)
    pe = params['pos_emb'][:S][None, :, :]
    te = jnp.take(params['type_emb'], token_type_ids, axis=0)
    x = (we + pe + te).astype(jnp.float32).reshape(B * S, HIDDEN)

    kernel = functools.partial(bert_fused_kernel,
                               num_layers=NUM_LAYERS, num_heads=NUM_HEADS,
                               batch=B, seq=S)
    # Single pallas_call, no grid: every operand is a whole-array VMEM block
    # (total weights + activations ~100 KiB f32, far under VMEM on v5e/v6e/v7x).
    return pl.pallas_call(
        kernel,
        out_shape=jax.ShapeDtypeStruct((B, NUM_LABELS), jnp.float32),
        scratch_shapes=[pltpu.VMEM((B * S, HIDDEN), jnp.float32)],    # ctx slab
    )(x, amask,
      params['emb_ln_g'], params['emb_ln_b'],
      params['wqkv'], params['bqkv'], params['wo'], params['bo'],
      params['ln1_g'], params['ln1_b'],
      params['wi'], params['bi'], params['wo2'], params['bo2'],
      params['ln2_g'], params['ln2_b'],
      params['wp'], params['bp'], params['wc'], params['bc'])


# ---------------- deterministic param init (layer-stacked weights) ----------------
def init_params(key):
    keys = iter(jax.random.split(key, 64))

    def nrm(shape):
        return (0.02 * jax.random.normal(next(keys), shape)).astype(jnp.float32)

    def zeros(shape):
        return jnp.zeros(shape, jnp.float32)

    def ones(shape):
        return jnp.ones(shape, jnp.float32)

    L, H, I = NUM_LAYERS, HIDDEN, INTERMEDIATE
    return {
        'word_emb': nrm((VOCAB, H)),
        'pos_emb': nrm((MAX_POS, H)),
        'type_emb': nrm((TYPE_VOCAB, H)),
        'emb_ln_g': ones((1, H)), 'emb_ln_b': zeros((1, H)),
        # encoder (stacked along leading layer axis)
        'wqkv': nrm((L, H, 3 * H)), 'bqkv': zeros((L, 1, 3 * H)),
        'wo': nrm((L, H, H)), 'bo': zeros((L, 1, H)),
        'ln1_g': ones((L, 1, H)), 'ln1_b': zeros((L, 1, H)),
        'wi': nrm((L, H, I)), 'bi': zeros((L, 1, I)),
        'wo2': nrm((L, I, H)), 'bo2': zeros((L, 1, H)),
        'ln2_g': ones((L, 1, H)), 'ln2_b': zeros((L, 1, H)),
        # pooler + classifier
        'wp': nrm((H, H)), 'bp': zeros((1, H)),
        'wc': nrm((H, NUM_LABELS)), 'bc': zeros((1, NUM_LABELS)),
    }


if __name__ == "__main__":
    key = jax.random.PRNGKey(0)
    kp, ki = jax.random.split(key)
    params = init_params(kp)

    B, S = 2, 8
    input_ids = jax.random.randint(ki, (B, S), 1, VOCAB).astype(jnp.int32)
    input_ids = input_ids.at[1, 6:].set(0)               # padding -> exercises the mask
    token_type_ids = jnp.zeros((B, S), dtype=jnp.int32)

    out = bert_forward(params, input_ids, token_type_ids)
    jax.block_until_ready(out)
    assert out.shape == (B, NUM_LABELS)
    print("KERNEL_OK")
</pallas_src>

<mosaic_0001>
module attributes {stable_mosaic.version = 11 : i64} {
  func.func @bert_fused_kernel(%arg0: memref<16x32xf32, #tpu.memory_space<vmem>>, %arg1: memref<2x1x8xf32, #tpu.memory_space<vmem>>, %arg2: memref<1x32xf32, #tpu.memory_space<vmem>>, %arg3: memref<1x32xf32, #tpu.memory_space<vmem>>, %arg4: memref<2x32x96xf32, #tpu.memory_space<vmem>>, %arg5: memref<2x1x96xf32, #tpu.memory_space<vmem>>, %arg6: memref<2x32x32xf32, #tpu.memory_space<vmem>>, %arg7: memref<2x1x32xf32, #tpu.memory_space<vmem>>, %arg8: memref<2x1x32xf32, #tpu.memory_space<vmem>>, %arg9: memref<2x1x32xf32, #tpu.memory_space<vmem>>, %arg10: memref<2x32x64xf32, #tpu.memory_space<vmem>>, %arg11: memref<2x1x64xf32, #tpu.memory_space<vmem>>, %arg12: memref<2x64x32xf32, #tpu.memory_space<vmem>>, %arg13: memref<2x1x32xf32, #tpu.memory_space<vmem>>, %arg14: memref<2x1x32xf32, #tpu.memory_space<vmem>>, %arg15: memref<2x1x32xf32, #tpu.memory_space<vmem>>, %arg16: memref<32x32xf32, #tpu.memory_space<vmem>>, %arg17: memref<1x32xf32, #tpu.memory_space<vmem>>, %arg18: memref<32x3xf32, #tpu.memory_space<vmem>>, %arg19: memref<1x3xf32, #tpu.memory_space<vmem>>, %arg20: memref<2x3xf32, #tpu.memory_space<vmem>>, %arg21: memref<16x32xf32, #tpu.memory_space<vmem>>) attributes {dimension_semantics = [], scalar_prefetch = 0 : i64, scratch_operands = 1 : i64, tpu.core_type = #tpu.core_type<tc>} {
    %c0 = arith.constant 0 : index
    %c0_0 = arith.constant 0 : index
    %0 = vector.load %arg0[%c0, %c0_0] : memref<16x32xf32, #tpu.memory_space<vmem>>, vector<16x32xf32>
    %c0_1 = arith.constant 0 : index
    %c0_2 = arith.constant 0 : index
    %1 = vector.load %arg2[%c0_1, %c0_2] : memref<1x32xf32, #tpu.memory_space<vmem>>, vector<1x32xf32>
    %c0_3 = arith.constant 0 : index
    %c0_4 = arith.constant 0 : index
    %2 = vector.load %arg3[%c0_3, %c0_4] : memref<1x32xf32, #tpu.memory_space<vmem>>, vector<1x32xf32>
    %cst = arith.constant dense<0.000000e+00> : vector<16xf32>
    %3 = vector.multi_reduction <add>, %0, %cst [1] : vector<16x32xf32> to vector<16xf32>
    %4 = vector.shape_cast %3 : vector<16xf32> to vector<16x1xf32>
    %cst_5 = arith.constant 3.200000e+01 : f32
    %5 = vector.broadcast %cst_5 : f32 to vector<16x1xf32>
    %6 = arith.divf %4, %5 : vector<16x1xf32>
    %7 = vector.broadcast %6 : vector<16x1xf32> to vector<16x32xf32>
    %8 = arith.subf %0, %7 : vector<16x32xf32>
    %9 = arith.mulf %8, %8 : vector<16x32xf32>
    %cst_6 = arith.constant dense<0.000000e+00> : vector<16xf32>
    %10 = vector.multi_reduction <add>, %9, %cst_6 [1] : vector<16x32xf32> to vector<16xf32>
    %11 = vector.shape_cast %10 : vector<16xf32> to vector<16x1xf32>
    %cst_7 = arith.constant 3.200000e+01 : f32
    %12 = vector.broadcast %cst_7 : f32 to vector<16x1xf32>
    %13 = arith.divf %11, %12 : vector<16x1xf32>
    %14 = vector.broadcast %6 : vector<16x1xf32> to vector<16x32xf32>
    %15 = arith.subf %0, %14 : vector<16x32xf32>
    %cst_8 = arith.constant 9.99999996E-13 : f32
    %16 = vector.broadcast %cst_8 : f32 to vector<16x1xf32>
    %17 = arith.addf %13, %16 : vector<16x1xf32>
    %18 = math.rsqrt %17 : vector<16x1xf32>
    %19 = vector.broadcast %18 : vector<16x1xf32> to vector<16x32xf32>
    %20 = arith.mulf %15, %19 : vector<16x32xf32>
    %21 = vector.broadcast %1 : vector<1x32xf32> to vector<16x32xf32>
    %22 = arith.mulf %20, %21 : vector<16x32xf32>
    %23 = vector.broadcast %2 : vector<1x32xf32> to vector<16x32xf32>
    %24 = arith.addf %22, %23 : vector<16x32xf32>
    %c0_i32 = arith.constant 0 : i32
    %c2_i32 = arith.constant 2 : i32
    %25 = arith.addi %c0_i32, %c2_i32 : i32
    %c1_i32 = arith.constant 1 : i32
    %26 = scf.for %arg22 = %c0_i32 to %25 step %c1_i32 iter_args(%arg23 = %24) -> (vector<16x32xf32>)  : i32 {
      %42 = arith.index_cast %arg22 : i32 to index
      %c0_22 = arith.constant 0 : index
      %c0_23 = arith.constant 0 : index
      %43 = vector.load %arg4[%42, %c0_22, %c0_23] : memref<2x32x96xf32, #tpu.memory_space<vmem>>, vector<1x32x96xf32>
      %44 = vector.shape_cast %43 : vector<1x32x96xf32> to vector<32x96xf32>
      %cst_24 = arith.constant dense<0.000000e+00> : vector<16x96xf32>
      %45 = tpu.matmul %arg23, %44, %cst_24 {dimension_numbers = #tpu.dot_dimension_numbers<[1], [0], [0], [1], [0, 0, 1, 1], [], []>} : vector<16x32xf32>, vector<32x96xf32>, vector<16x96xf32> -> vector<16x96xf32>
      %46 = arith.index_cast %arg22 : i32 to index
      %c0_25 = arith.constant 0 : index
      %c0_26 = arith.constant 0 : index
      %47 = vector.load %arg5[%46, %c0_25, %c0_26] : memref<2x1x96xf32, #tpu.memory_space<vmem>>, vector<1x1x96xf32>
      %48 = vector.shape_cast %47 : vector<1x1x96xf32> to vector<1x96xf32>
      %49 = vector.broadcast %48 : vector<1x96xf32> to vector<16x96xf32>
      %50 = arith.addf %45, %49 : vector<16x96xf32>
      %51 = vector.extract_strided_slice %50 {offsets = [0, 0], sizes = [16, 32], strides = [1, 1]} : vector<16x96xf32> to vector<16x32xf32>
      %52 = vector.extract_strided_slice %50 {offsets = [0, 32], sizes = [16, 32], strides = [1, 1]} : vector<16x96xf32> to vector<16x32xf32>
      %53 = vector.extract_strided_slice %50 {offsets = [0, 64], sizes = [16, 32], strides = [1, 1]} : vector<16x96xf32> to vector<16x32xf32>
      %c0_27 = arith.constant 0 : index
      %c0_28 = arith.constant 0 : index
      %c0_29 = arith.constant 0 : index
      %54 = vector.load %arg1[%c0_27, %c0_28, %c0_29] : memref<2x1x8xf32, #tpu.memory_space<vmem>>, vector<1x1x8xf32>
      %55 = vector.shape_cast %54 : vector<1x1x8xf32> to vector<1x8xf32>
      %56 = vector.extract_strided_slice %51 {offsets = [0, 0], sizes = [8, 8], strides = [1, 1]} : vector<16x32xf32> to vector<8x8xf32>
      %57 = vector.extract_strided_slice %52 {offsets = [0, 0], sizes = [8, 8], strides = [1, 1]} : vector<16x32xf32> to vector<8x8xf32>
      %58 = vector.extract_strided_slice %53 {offsets = [0, 0], sizes = [8, 8], strides = [1, 1]} : vector<16x32xf32> to vector<8x8xf32>
      %59 = tpu.transpose %57, [1, 0] : vector<8x8xf32> -> vector<8x8xf32>
      %cst_30 = arith.constant dense<0.000000e+00> : vector<8x8xf32>
      %60 = tpu.matmul %56, %59, %cst_30 {dimension_numbers = #tpu.dot_dimension_numbers<[1], [0], [0], [1], [0, 0, 1, 1], [], []>} : vector<8x8xf32>, vector<8x8xf32>, vector<8x8xf32> -> vector<8x8xf32>
      %cst_31 = arith.constant 0.353553385 : f32
      %61 = vector.broadcast %cst_31 : f32 to vector<8x8xf32>
      %62 = arith.mulf %60, %61 : vector<8x8xf32>
      %63 = vector.broadcast %55 : vector<1x8xf32> to vector<8x8xf32>
      %64 = arith.addf %62, %63 : vector<8x8xf32>
      %cst_32 = arith.constant dense<0xFF800000> : vector<8xf32>
      %65 = vector.multi_reduction <maximumf>, %64, %cst_32 [1] : vector<8x8xf32> to vector<8xf32>
      %66 = vector.shape_cast %65 : vector<8xf32> to vector<8x1xf32>
      %67 = vector.broadcast %66 : vector<8x1xf32> to vector<8x8xf32>
      %68 = arith.subf %64, %67 : vector<8x8xf32>
      %69 = math.exp %68 : vector<8x8xf32>
      %cst_33 = arith.constant dense<0.000000e+00> : vector<8xf32>
      %70 = vector.multi_reduction <add>, %69, %cst_33 [1] : vector<8x8xf32> to vector<8xf32>
      %71 = vector.shape_cast %70 : vector<8xf32> to vector<8x1xf32>
      %72 = tpu.reciprocal %71 {approx = true} : vector<8x1xf32> -> vector<8x1xf32>
      %73 = vector.broadcast %72 : vector<8x1xf32> to vector<8x8xf32>
      %74 = arith.mulf %69, %73 : vector<8x8xf32>
      %cst_34 = arith.constant dense<0.000000e+00> : vector<8x8xf32>
      %75 = tpu.matmul %74, %58, %cst_34 {dimension_numbers = #tpu.dot_dimension_numbers<[1], [0], [0], [1], [0, 0, 1, 1], [], []>} : vector<8x8xf32>, vector<8x8xf32>, vector<8x8xf32> -> vector<8x8xf32>
      %c0_35 = arith.constant 0 : index
      %c0_36 = arith.constant 0 : index
      %76 = vector.load %arg21[%c0_35, %c0_36] : memref<16x32xf32, #tpu.memory_space<vmem>>, vector<8x8xf32>
      tpu.vector_store %arg21[%c0_35, %c0_36], %75 {strides = array<i32>} : memref<16x32xf32, #tpu.memory_space<vmem>>, vector<8x8xf32>,
      %77 = vector.extract_strided_slice %51 {offsets = [0, 8], sizes = [8, 8], strides = [1, 1]} : vector<16x32xf32> to vector<8x8xf32>
      %78 = vector.extract_strided_slice %52 {offsets = [0, 8], sizes = [8, 8], strides = [1, 1]} : vector<16x32xf32> to vector<8x8xf32>
      %79 = vector.extract_strided_slice %53 {offsets = [0, 8], sizes = [8, 8], strides = [1, 1]} : vector<16x32xf32> to vector<8x8xf32>
      %80 = tpu.transpose %78, [1, 0] : vector<8x8xf32> -> vector<8x8xf32>
      %cst_37 = arith.constant dense<0.000000e+00> : vector<8x8xf32>
      %81 = tpu.matmul %77, %80, %cst_37 {dimension_numbers = #tpu.dot_dimension_numbers<[1], [0], [0], [1], [0, 0, 1, 1], [], []>} : vector<8x8xf32>, vector<8x8xf32>, vector<8x8xf32> -> vector<8x8xf32>
      %cst_38 = arith.constant 0.353553385 : f32
      %82 = vector.broadcast %cst_38 : f32 to vector<8x8xf32>
      %83 = arith.mulf %81, %82 : vector<8x8xf32>
      %84 = vector.broadcast %55 : vector<1x8xf32> to vector<8x8xf32>
      %85 = arith.addf %83, %84 : vector<8x8xf32>
      %cst_39 = arith.constant dense<0xFF800000> : vector<8xf32>
      %86 = vector.multi_reduction <maximumf>, %85, %cst_39 [1] : vector<8x8xf32> to vector<8xf32>
      %87 = vector.shape_cast %86 : vector<8xf32> to vector<8x1xf32>
      %88 = vector.broadcast %87 : vector<8x1xf32> to vector<8x8xf32>
      %89 = arith.subf %85, %88 : vector<8x8xf32>
      %90 = math.exp %89 : vector<8x8xf32>
      %cst_40 = arith.constant dense<0.000000e+00> : vector<8xf32>
      %91 = vector.multi_reduction <add>, %90, %cst_40 [1] : vector<8x8xf32> to vector<8xf32>
      %92 = vector.shape_cast %91 : vector<8xf32> to vector<8x1xf32>
      %93 = tpu.reciprocal %92 {approx = true} : vector<8x1xf32> -> vector<8x1xf32>
      %94 = vector.broadcast %93 : vector<8x1xf32> to vector<8x8xf32>
      %95 = arith.mulf %90, %94 : vector<8x8xf32>
      %cst_41 = arith.constant dense<0.000000e+00> : vector<8x8xf32>
      %96 = tpu.matmul %95, %79, %cst_41 {dimension_numbers = #tpu.dot_dimension_numbers<[1], [0], [0], [1], [0, 0, 1, 1], [], []>} : vector<8x8xf32>, vector<8x8xf32>, vector<8x8xf32> -> vector<8x8xf32>
      %c0_42 = arith.constant 0 : index
      %c8 = arith.constant 8 : index
      %97 = vector.load %arg21[%c0_42, %c8] : memref<16x32xf32, #tpu.memory_space<vmem>>, vector<8x8xf32>
      tpu.vector_store %arg21[%c0_42, %c8], %96 {strides = array<i32>} : memref<16x32xf32, #tpu.memory_space<vmem>>, vector<8x8xf32>,
      %98 = vector.extract_strided_slice %51 {offsets = [0, 16], sizes = [8, 8], strides = [1, 1]} : vector<16x32xf32> to vector<8x8xf32>
      %99 = vector.extract_strided_slice %52 {offsets = [0, 16], sizes = [8, 8], strides = [1, 1]} : vector<16x32xf32> to vector<8x8xf32>
      %100 = vector.extract_strided_slice %53 {offsets = [0, 16], sizes = [8, 8], strides = [1, 1]} : vector<16x32xf32> to vector<8x8xf32>
      %101 = tpu.transpose %99, [1, 0] : vector<8x8xf32> -> vector<8x8xf32>
      %cst_43 = arith.constant dense<0.000000e+00> : vector<8x8xf32>
      %102 = tpu.matmul %98, %101, %cst_43 {dimension_numbers = #tpu.dot_dimension_numbers<[1], [0], [0], [1], [0, 0, 1, 1], [], []>} : vector<8x8xf32>, vector<8x8xf32>, vector<8x8xf32> -> vector<8x8xf32>
      %cst_44 = arith.constant 0.353553385 : f32
      %103 = vector.broadcast %cst_44 : f32 to vector<8x8xf32>
      %104 = arith.mulf %102, %103 : vector<8x8xf32>
      %105 = vector.broadcast %55 : vector<1x8xf32> to vector<8x8xf32>
      %106 = arith.addf %104, %105 : vector<8x8xf32>
      %cst_45 = arith.constant dense<0xFF800000> : vector<8xf32>
      %107 = vector.multi_reduction <maximumf>, %106, %cst_45 [1] : vector<8x8xf32> to vector<8xf32>
      %108 = vector.shape_cast %107 : vector<8xf32> to vector<8x1xf32>
      %109 = vector.broadcast %108 : vector<8x1xf32> to vector<8x8xf32>
      %110 = arith.subf %106, %109 : vector<8x8xf32>
      %111 = math.exp %110 : vector<8x8xf32>
      %cst_46 = arith.constant dense<0.000000e+00> : vector<8xf32>
      %112 = vector.multi_reduction <add>, %111, %cst_46 [1] : vector<8x8xf32> to vector<8xf32>
      %113 = vector.shape_cast %112 : vector<8xf32> to vector<8x1xf32>
      %114 = tpu.reciprocal %113 {approx = true} : vector<8x1xf32> -> vector<8x1xf32>
      %115 = vector.broadcast %114 : vector<8x1xf32> to vector<8x8xf32>
      %116 = arith.mulf %111, %115 : vector<8x8xf32>
      %cst_47 = arith.constant dense<0.000000e+00> : vector<8x8xf32>
      %117 = tpu.matmul %116, %100, %cst_47 {dimension_numbers = #tpu.dot_dimension_numbers<[1], [0], [0], [1], [0, 0, 1, 1], [], []>} : vector<8x8xf32>, vector<8x8xf32>, vector<8x8xf32> -> vector<8x8xf32>
      %c0_48 = arith.constant 0 : index
      %c16 = arith.constant 16 : index
      %118 = vector.load %arg21[%c0_48, %c16] : memref<16x32xf32, #tpu.memory_space<vmem>>, vector<8x8xf32>
      tpu.vector_store %arg21[%c0_48, %c16], %117 {strides = array<i32>} : memref<16x32xf32, #tpu.memory_space<vmem>>, vector<8x8xf32>,
      %119 = vector.extract_strided_slice %51 {offsets = [0, 24], sizes = [8, 8], strides = [1, 1]} : vector<16x32xf32> to vector<8x8xf32>
      %120 = vector.extract_strided_slice %52 {offsets = [0, 24], sizes = [8, 8], strides = [1, 1]} : vector<16x32xf32> to vector<8x8xf32>
      %121 = vector.extract_strided_slice %53 {offsets = [0, 24], sizes = [8, 8], strides = [1, 1]} : vector<16x32xf32> to vector<8x8xf32>
      %122 = tpu.transpose %120, [1, 0] : vector<8x8xf32> -> vector<8x8xf32>
      %cst_49 = arith.constant dense<0.000000e+00> : vector<8x8xf32>
      %123 = tpu.matmul %119, %122, %cst_49 {dimension_numbers = #tpu.dot_dimension_numbers<[1], [0], [0], [1], [0, 0, 1, 1], [], []>} : vector<8x8xf32>, vector<8x8xf32>, vector<8x8xf32> -> vector<8x8xf32>
      %cst_50 = arith.constant 0.353553385 : f32
      %124 = vector.broadcast %cst_50 : f32 to vector<8x8xf32>
      %125 = arith.mulf %123, %124 : vector<8x8xf32>
      %126 = vector.broadcast %55 : vector<1x8xf32> to vector<8x8xf32>
      %127 = arith.addf %125, %126 : vector<8x8xf32>
      %cst_51 = arith.constant dense<0xFF800000> : vector<8xf32>
      %128 = vector.multi_reduction <maximumf>, %127, %cst_51 [1] : vector<8x8xf32> to vector<8xf32>
      %129 = vector.shape_cast %128 : vector<8xf32> to vector<8x1xf32>
      %130 = vector.broadcast %129 : vector<8x1xf32> to vector<8x8xf32>
      %131 = arith.subf %127, %130 : vector<8x8xf32>
      %132 = math.exp %131 : vector<8x8xf32>
      %cst_52 = arith.constant dense<0.000000e+00> : vector<8xf32>
      %133 = vector.multi_reduction <add>, %132, %cst_52 [1] : vector<8x8xf32> to vector<8xf32>
      %134 = vector.shape_cast %133 : vector<8xf32> to vector<8x1xf32>
      %135 = tpu.reciprocal %134 {approx = true} : vector<8x1xf32> -> vector<8x1xf32>
      %136 = vector.broadcast %135 : vector<8x1xf32> to vector<8x8xf32>
      %137 = arith.mulf %132, %136 : vector<8x8xf32>
      %cst_53 = arith.constant dense<0.000000e+00> : vector<8x8xf32>
      %138 = tpu.matmul %137, %121, %cst_53 {dimension_numbers = #tpu.dot_dimension_numbers<[1], [0], [0], [1], [0, 0, 1, 1], [], []>} : vector<8x8xf32>, vector<8x8xf32>, vector<8x8xf32> -> vector<8x8xf32>
      %c0_54 = arith.constant 0 : index
      %c24 = arith.constant 24 : index
      %139 = vector.load %arg21[%c0_54, %c24] : memref<16x32xf32, #tpu.memory_space<vmem>>, vector<8x8xf32>
      tpu.vector_store %arg21[%c0_54, %c24], %138 {strides = array<i32>} : memref<16x32xf32, #tpu.memory_space<vmem>>, vector<8x8xf32>,
      %c1 = arith.constant 1 : index
      %c0_55 = arith.constant 0 : index
      %c0_56 = arith.constant 0 : index
      %140 = vector.load %arg1[%c1, %c0_55, %c0_56] : memref<2x1x8xf32, #tpu.memory_space<vmem>>, vector<1x1x8xf32>
      %141 = vector.shape_cast %140 : vector<1x1x8xf32> to vector<1x8xf32>
      %142 = vector.extract_strided_slice %51 {offsets = [8, 0], sizes = [8, 8], strides = [1, 1]} : vector<16x32xf32> to vector<8x8xf32>
      %143 = vector.extract_strided_slice %52 {offsets = [8, 0], sizes = [8, 8], strides = [1, 1]} : vector<16x32xf32> to vector<8x8xf32>
      %144 = vector.extract_strided_slice %53 {offsets = [8, 0], sizes = [8, 8], strides = [1, 1]} : vector<16x32xf32> to vector<8x8xf32>
      %145 = tpu.transpose %143, [1, 0] : vector<8x8xf32> -> vector<8x8xf32>
      %cst_57 = arith.constant dense<0.000000e+00> : vector<8x8xf32>
      %146 = tpu.matmul %142, %145, %cst_57 {dimension_numbers = #tpu.dot_dimension_numbers<[1], [0], [0], [1], [0, 0, 1, 1], [], []>} : vector<8x8xf32>, vector<8x8xf32>, vector<8x8xf32> -> vector<8x8xf32>
      %cst_58 = arith.constant 0.353553385 : f32
      %147 = vector.broadcast %cst_58 : f32 to vector<8x8xf32>
      %148 = arith.mulf %146, %147 : vector<8x8xf32>
      %149 = vector.broadcast %141 : vector<1x8xf32> to vector<8x8xf32>
      %150 = arith.addf %148, %149 : vector<8x8xf32>
      %cst_59 = arith.constant dense<0xFF800000> : vector<8xf32>
      %151 = vector.multi_reduction <maximumf>, %150, %cst_59 [1] : vector<8x8xf32> to vector<8xf32>
      %152 = vector.shape_cast %151 : vector<8xf32> to vector<8x1xf32>
      %153 = vector.broadcast %152 : vector<8x1xf32> to vector<8x8xf32>
      %154 = arith.subf %150, %153 : vector<8x8xf32>
      %155 = math.exp %154 : vector<8x8xf32>
      %cst_60 = arith.constant dense<0.000000e+00> : vector<8xf32>
      %156 = vector.multi_reduction <add>, %155, %cst_60 [1] : vector<8x8xf32> to vector<8xf32>
      %157 = vector.shape_cast %156 : vector<8xf32> to vector<8x1xf32>
      %158 = tpu.reciprocal %157 {approx = true} : vector<8x1xf32> -> vector<8x1xf32>
      %159 = vector.broadcast %158 : vector<8x1xf32> to vector<8x8xf32>
      %160 = arith.mulf %155, %159 : vector<8x8xf32>
      %cst_61 = arith.constant dense<0.000000e+00> : vector<8x8xf32>
      %161 = tpu.matmul %160, %144, %cst_61 {dimension_numbers = #tpu.dot_dimension_numbers<[1], [0], [0], [1], [0, 0, 1, 1], [], []>} : vector<8x8xf32>, vector<8x8xf32>, vector<8x8xf32> -> vector<8x8xf32>
      %c8_62 = arith.constant 8 : index
      %c0_63 = arith.constant 0 : index
      %162 = vector.load %arg21[%c8_62, %c0_63] : memref<16x32xf32, #tpu.memory_space<vmem>>, vector<8x8xf32>
      tpu.vector_store %arg21[%c8_62, %c0_63], %161 {strides = array<i32>} : memref<16x32xf32, #tpu.memory_space<vmem>>, vector<8x8xf32>,
      %163 = vector.extract_strided_slice %51 {offsets = [8, 8], sizes = [8, 8], strides = [1, 1]} : vector<16x32xf32> to vector<8x8xf32>
      %164 = vector.extract_strided_slice %52 {offsets = [8, 8], sizes = [8, 8], strides = [1, 1]} : vector<16x32xf32> to vector<8x8xf32>
      %165 = vector.extract_strided_slice %53 {offsets = [8, 8], sizes = [8, 8], strides = [1, 1]} : vector<16x32xf32> to vector<8x8xf32>
      %166 = tpu.transpose %164, [1, 0] : vector<8x8xf32> -> vector<8x8xf32>
      %cst_64 = arith.constant dense<0.000000e+00> : vector<8x8xf32>
      %167 = tpu.matmul %163, %166, %cst_64 {dimension_numbers = #tpu.dot_dimension_numbers<[1], [0], [0], [1], [0, 0, 1, 1], [], []>} : vector<8x8xf32>, vector<8x8xf32>, vector<8x8xf32> -> vector<8x8xf32>
      %cst_65 = arith.constant 0.353553385 : f32
      %168 = vector.broadcast %cst_65 : f32 to vector<8x8xf32>
      %169 = arith.mulf %167, %168 : vector<8x8xf32>
      %170 = vector.broadcast %141 : vector<1x8xf32> to vector<8x8xf32>
      %171 = arith.addf %169, %170 : vector<8x8xf32>
      %cst_66 = arith.constant dense<0xFF800000> : vector<8xf32>
      %172 = vector.multi_reduction <maximumf>, %171, %cst_66 [1] : vector<8x8xf32> to vector<8xf32>
      %173 = vector.shape_cast %172 : vector<8xf32> to vector<8x1xf32>
      %174 = vector.broadcast %173 : vector<8x1xf32> to vector<8x8xf32>
      %175 = arith.subf %171, %174 : vector<8x8xf32>
      %176 = math.exp %175 : vector<8x8xf32>
      %cst_67 = arith.constant dense<0.000000e+00> : vector<8xf32>
      %177 = vector.multi_reduction <add>, %176, %cst_67 [1] : vector<8x8xf32> to vector<8xf32>
      %178 = vector.shape_cast %177 : vector<8xf32> to vector<8x1xf32>
      %179 = tpu.reciprocal %178 {approx = true} : vector<8x1xf32> -> vector<8x1xf32>
      %180 = vector.broadcast %179 : vector<8x1xf32> to vector<8x8xf32>
      %181 = arith.mulf %176, %180 : vector<8x8xf32>
      %cst_68 = arith.constant dense<0.000000e+00> : vector<8x8xf32>
      %182 = tpu.matmul %181, %165, %cst_68 {dimension_numbers = #tpu.dot_dimension_numbers<[1], [0], [0], [1], [0, 0, 1, 1], [], []>} : vector<8x8xf32>, vector<8x8xf32>, vector<8x8xf32> -> vector<8x8xf32>
      %c8_69 = arith.constant 8 : index
      %c8_70 = arith.constant 8 : index
      %183 = vector.load %arg21[%c8_69, %c8_70] : memref<16x32xf32, #tpu.memory_space<vmem>>, vector<8x8xf32>
      tpu.vector_store %arg21[%c8_69, %c8_70], %182 {strides = array<i32>} : memref<16x32xf32, #tpu.memory_space<vmem>>, vector<8x8xf32>,
      %184 = vector.extract_strided_slice %51 {offsets = [8, 16], sizes = [8, 8], strides = [1, 1]} : vector<16x32xf32> to vector<8x8xf32>
      %185 = vector.extract_strided_slice %52 {offsets = [8, 16], sizes = [8, 8], strides = [1, 1]} : vector<16x32xf32> to vector<8x8xf32>
      %186 = vector.extract_strided_slice %53 {offsets = [8, 16], sizes = [8, 8], strides = [1, 1]} : vector<16x32xf32> to vector<8x8xf32>
      %187 = tpu.transpose %185, [1, 0] : vector<8x8xf32> -> vector<8x8xf32>
      %cst_71 = arith.constant dense<0.000000e+00> : vector<8x8xf32>
      %188 = tpu.matmul %184, %187, %cst_71 {dimension_numbers = #tpu.dot_dimension_numbers<[1], [0], [0], [1], [0, 0, 1, 1], [], []>} : vector<8x8xf32>, vector<8x8xf32>, vector<8x8xf32> -> vector<8x8xf32>
      %cst_72 = arith.constant 0.353553385 : f32
      %189 = vector.broadcast %cst_72 : f32 to vector<8x8xf32>
      %190 = arith.mulf %188, %189 : vector<8x8xf32>
      %191 = vector.broadcast %141 : vector<1x8xf32> to vector<8x8xf32>
      %192 = arith.addf %190, %191 : vector<8x8xf32>
      %cst_73 = arith.constant dense<0xFF800000> : vector<8xf32>
      %193 = vector.multi_reduction <maximumf>, %192, %cst_73 [1] : vector<8x8xf32> to vector<8xf32>
      %194 = vector.shape_cast %193 : vector<8xf32> to vector<8x1xf32>
      %195 = vector.broadcast %194 : vector<8x1xf32> to vector<8x8xf32>
      %196 = arith.subf %192, %195 : vector<8x8xf32>
      %197 = math.exp %196 : vector<8x8xf32>
      %cst_74 = arith.constant dense<0.000000e+00> : vector<8xf32>
      %198 = vector.multi_reduction <add>, %197, %cst_74 [1] : vector<8x8xf32> to vector<8xf32>
      %199 = vector.shape_cast %198 : vector<8xf32> to vector<8x1xf32>
      %200 = tpu.reciprocal %199 {approx = true} : vector<8x1xf32> -> vector<8x1xf32>
      %201 = vector.broadcast %200 : vector<8x1xf32> to vector<8x8xf32>
      %202 = arith.mulf %197, %201 : vector<8x8xf32>
      %cst_75 = arith.constant dense<0.000000e+00> : vector<8x8xf32>
      %203 = tpu.matmul %202, %186, %cst_75 {dimension_numbers = #tpu.dot_dimension_numbers<[1], [0], [0], [1], [0, 0, 1, 1], [], []>} : vector<8x8xf32>, vector<8x8xf32>, vector<8x8xf32> -> vector<8x8xf32>
      %c8_76 = arith.constant 8 : index
      %c16_77 = arith.constant 16 : index
      %204 = vector.load %arg21[%c8_76, %c16_77] : memref<16x32xf32, #tpu.memory_space<vmem>>, vector<8x8xf32>
      tpu.vector_store %arg21[%c8_76, %c16_77], %203 {strides = array<i32>} : memref<16x32xf32, #tpu.memory_space<vmem>>, vector<8x8xf32>,
      %205 = vector.extract_strided_slice %51 {offsets = [8, 24], sizes = [8, 8], strides = [1, 1]} : vector<16x32xf32> to vector<8x8xf32>
      %206 = vector.extract_strided_slice %52 {offsets = [8, 24], sizes = [8, 8], strides = [1, 1]} : vector<16x32xf32> to vector<8x8xf32>
      %207 = vector.extract_strided_slice %53 {offsets = [8, 24], sizes = [8, 8], strides = [1, 1]} : vector<16x32xf32> to vector<8x8xf32>
      %208 = tpu.transpose %206, [1, 0] : vector<8x8xf32> -> vector<8x8xf32>
      %cst_78 = arith.constant dense<0.000000e+00> : vector<8x8xf32>
      %209 = tpu.matmul %205, %208, %cst_78 {dimension_numbers = #tpu.dot_dimension_numbers<[1], [0], [0], [1], [0, 0, 1, 1], [], []>} : vector<8x8xf32>, vector<8x8xf32>, vector<8x8xf32> -> vector<8x8xf32>
      %cst_79 = arith.constant 0.353553385 : f32
      %210 = vector.broadcast %cst_79 : f32 to vector<8x8xf32>
      %211 = arith.mulf %209, %210 : vector<8x8xf32>
      %212 = vector.broadcast %141 : vector<1x8xf32> to vector<8x8xf32>
      %213 = arith.addf %211, %212 : vector<8x8xf32>
      %cst_80 = arith.constant dense<0xFF800000> : vector<8xf32>
      %214 = vector.multi_reduction <maximumf>, %213, %cst_80 [1] : vector<8x8xf32> to vector<8xf32>
      %215 = vector.shape_cast %214 : vector<8xf32> to vector<8x1xf32>
      %216 = vector.broadcast %215 : vector<8x1xf32> to vector<8x8xf32>
      %217 = arith.subf %213, %216 : vector<8x8xf32>
      %218 = math.exp %217 : vector<8x8xf32>
      %cst_81 = arith.constant dense<0.000000e+00> : vector<8xf32>
      %219 = vector.multi_reduction <add>, %218, %cst_81 [1] : vector<8x8xf32> to vector<8xf32>
      %220 = vector.shape_cast %219 : vector<8xf32> to vector<8x1xf32>
      %221 = tpu.reciprocal %220 {approx = true} : vector<8x1xf32> -> vector<8x1xf32>
      %222 = vector.broadcast %221 : vector<8x1xf32> to vector<8x8xf32>
      %223 = arith.mulf %218, %222 : vector<8x8xf32>
      %cst_82 = arith.constant dense<0.000000e+00> : vector<8x8xf32>
      %224 = tpu.matmul %223, %207, %cst_82 {dimension_numbers = #tpu.dot_dimension_numbers<[1], [0], [0], [1], [0, 0, 1, 1], [], []>} : vector<8x8xf32>, vector<8x8xf32>, vector<8x8xf32> -> vector<8x8xf32>
      %c8_83 = arith.constant 8 : index
      %c24_84 = arith.constant 24 : index
      %225 = vector.load %arg21[%c8_83, %c24_84] : memref<16x32xf32, #tpu.memory_space<vmem>>, vector<8x8xf32>
      tpu.vector_store %arg21[%c8_83, %c24_84], %224 {strides = array<i32>} : memref<16x32xf32, #tpu.memory_space<vmem>>, vector<8x8xf32>,
      %c0_85 = arith.constant 0 : index
      %c0_86 = arith.constant 0 : index
      %226 = vector.load %arg21[%c0_85, %c0_86] : memref<16x32xf32, #tpu.memory_space<vmem>>, vector<16x32xf32>
      %227 = arith.index_cast %arg22 : i32 to index
      %c0_87 = arith.constant 0 : index
      %c0_88 = arith.constant 0 : index
      %228 = vector.load %arg6[%227, %c0_87, %c0_88] : memref<2x32x32xf32, #tpu.memory_space<vmem>>, vector<1x32x32xf32>
      %229 = vector.shape_cast %228 : vector<1x32x32xf32> to vector<32x32xf32>
      %cst_89 = arith.constant dense<0.000000e+00> : vector<16x32xf32>
      %230 = tpu.matmul %226, %229, %cst_89 {dimension_numbers = #tpu.dot_dimension_numbers<[1], [0], [0], [1], [0, 0, 1, 1], [], []>} : vector<16x32xf32>, vector<32x32xf32>, vector<16x32xf32> -> vector<16x32xf32>
      %231 = arith.index_cast %arg22 : i32 to index
      %c0_90 = arith.constant 0 : index
      %c0_91 = arith.constant 0 : index
      %232 = vector.load %arg7[%231, %c0_90, %c0_91] : memref<2x1x32xf32, #tpu.memory_space<vmem>>, vector<1x1x32xf32>
      %233 = vector.shape_cast %232 : vector<1x1x32xf32> to vector<1x32xf32>
      %234 = vector.broadcast %233 : vector<1x32xf32> to vector<16x32xf32>
      %235 = arith.addf %230, %234 : vector<16x32xf32>
      %236 = arith.addf %arg23, %235 : vector<16x32xf32>
      %237 = arith.index_cast %arg22 : i32 to index
      %c0_92 = arith.constant 0 : index
      %c0_93 = arith.constant 0 : index
      %238 = vector.load %arg8[%237, %c0_92, %c0_93] : memref<2x1x32xf32, #tpu.memory_space<vmem>>, vector<1x1x32xf32>
      %239 = vector.shape_cast %238 : vector<1x1x32xf32> to vector<1x32xf32>
      %240 = arith.index_cast %arg22 : i32 to index
      %c0_94 = arith.constant 0 : index
      %c0_95 = arith.constant 0 : index
      %241 = vector.load %arg9[%240, %c0_94, %c0_95] : memref<2x1x32xf32, #tpu.memory_space<vmem>>, vector<1x1x32xf32>
      %242 = vector.shape_cast %241 : vector<1x1x32xf32> to vector<1x32xf32>
      %cst_96 = arith.constant dense<0.000000e+00> : vector<16xf32>
      %243 = vector.multi_reduction <add>, %236, %cst_96 [1] : vector<16x32xf32> to vector<16xf32>
      %244 = vector.shape_cast %243 : vector<16xf32> to vector<16x1xf32>
      %cst_97 = arith.constant 3.200000e+01 : f32
      %245 = vector.broadcast %cst_97 : f32 to vector<16x1xf32>
      %246 = arith.divf %244, %245 : vector<16x1xf32>
      %247 = vector.broadcast %246 : vector<16x1xf32> to vector<16x32xf32>
      %248 = arith.subf %236, %247 : vector<16x32xf32>
      %249 = arith.mulf %248, %248 : vector<16x32xf32>
      %cst_98 = arith.constant dense<0.000000e+00> : vector<16xf32>
      %250 = vector.multi_reduction <add>, %249, %cst_98 [1] : vector<16x32xf32> to vector<16xf32>
      %251 = vector.shape_cast %250 : vector<16xf32> to vector<16x1xf32>
      %cst_99 = arith.constant 3.200000e+01 : f32
      %252 = vector.broadcast %cst_99 : f32 to vector<16x1xf32>
      %253 = arith.divf %251, %252 : vector<16x1xf32>
      %254 = vector.broadcast %246 : vector<16x1xf32> to vector<16x32xf32>
      %255 = arith.subf %236, %254 : vector<16x32xf32>
      %cst_100 = arith.constant 9.99999996E-13 : f32
      %256 = vector.broadcast %cst_100 : f32 to vector<16x1xf32>
      %257 = arith.addf %253, %256 : vector<16x1xf32>
      %258 = math.rsqrt %257 : vector<16x1xf32>
      %259 = vector.broadcast %258 : vector<16x1xf32> to vector<16x32xf32>
      %260 = arith.mulf %255, %259 : vector<16x32xf32>
      %261 = vector.broadcast %239 : vector<1x32xf32> to vector<16x32xf32>
      %262 = arith.mulf %260, %261 : vector<16x32xf32>
      %263 = vector.broadcast %242 : vector<1x32xf32> to vector<16x32xf32>
      %264 = arith.addf %262, %263 : vector<16x32xf32>
      %265 = arith.index_cast %arg22 : i32 to index
      %c0_101 = arith.constant 0 : index
      %c0_102 = arith.constant 0 : index
      %266 = vector.load %arg10[%265, %c0_101, %c0_102] : memref<2x32x64xf32, #tpu.memory_space<vmem>>, vector<1x32x64xf32>
      %267 = vector.shape_cast %266 : vector<1x32x64xf32> to vector<32x64xf32>
      %cst_103 = arith.constant dense<0.000000e+00> : vector<16x64xf32>
      %268 = tpu.matmul %264, %267, %cst_103 {dimension_numbers = #tpu.dot_dimension_numbers<[1], [0], [0], [1], [0, 0, 1, 1], [], []>} : vector<16x32xf32>, vector<32x64xf32>, vector<16x64xf32> -> vector<16x64xf32>
      %269 = arith.index_cast %arg22 : i32 to index
      %c0_104 = arith.constant 0 : index
      %c0_105 = arith.constant 0 : index
      %270 = vector.load %arg11[%269, %c0_104, %c0_105] : memref<2x1x64xf32, #tpu.memory_space<vmem>>, vector<1x1x64xf32>
      %271 = vector.shape_cast %270 : vector<1x1x64xf32> to vector<1x64xf32>
      %272 = vector.broadcast %271 : vector<1x64xf32> to vector<16x64xf32>
      %273 = arith.addf %268, %272 : vector<16x64xf32>
      %cst_106 = arith.constant 5.000000e-01 : f32
      %274 = vector.broadcast %cst_106 : f32 to vector<16x64xf32>
      %275 = arith.mulf %274, %273 : vector<16x64xf32>
      %cst_107 = arith.constant 4.471500e-02 : f32
      %276 = vector.broadcast %cst_107 : f32 to vector<16x64xf32>
      %277 = arith.mulf %276, %273 : vector<16x64xf32>
      %278 = arith.mulf %277, %273 : vector<16x64xf32>
      %279 = arith.mulf %278, %273 : vector<16x64xf32>
      %280 = arith.addf %273, %279 : vector<16x64xf32>
      %cst_108 = arith.constant 0.797884583 : f32
      %281 = vector.broadcast %cst_108 : f32 to vector<16x64xf32>
      %282 = arith.mulf %281, %280 : vector<16x64xf32>
      %283 = math.tanh %282 : vector<16x64xf32>
      %cst_109 = arith.constant 1.000000e+00 : f32
      %284 = vector.broadcast %cst_109 : f32 to vector<16x64xf32>
      %285 = arith.addf %284, %283 : vector<16x64xf32>
      %286 = arith.mulf %275, %285 : vector<16x64xf32>
      %287 = arith.index_cast %arg22 : i32 to index
      %c0_110 = arith.constant 0 : index
      %c0_111 = arith.constant 0 : index
      %288 = vector.load %arg12[%287, %c0_110, %c0_111] : memref<2x64x32xf32, #tpu.memory_space<vmem>>, vector<1x64x32xf32>
      %289 = vector.shape_cast %288 : vector<1x64x32xf32> to vector<64x32xf32>
      %cst_112 = arith.constant dense<0.000000e+00> : vector<16x32xf32>
      %290 = tpu.matmul %286, %289, %cst_112 {dimension_numbers = #tpu.dot_dimension_numbers<[1], [0], [0], [1], [0, 0, 1, 1], [], []>} : vector<16x64xf32>, vector<64x32xf32>, vector<16x32xf32> -> vector<16x32xf32>
      %291 = arith.index_cast %arg22 : i32 to index
      %c0_113 = arith.constant 0 : index
      %c0_114 = arith.constant 0 : index
      %292 = vector.load %arg13[%291, %c0_113, %c0_114] : memref<2x1x32xf32, #tpu.memory_space<vmem>>, vector<1x1x32xf32>
      %293 = vector.shape_cast %292 : vector<1x1x32xf32> to vector<1x32xf32>
      %294 = vector.broadcast %293 : vector<1x32xf32> to vector<16x32xf32>
      %295 = arith.addf %290, %294 : vector<16x32xf32>
      %296 = arith.addf %264, %295 : vector<16x32xf32>
      %297 = arith.index_cast %arg22 : i32 to index
      %c0_115 = arith.constant 0 : index
      %c0_116 = arith.constant 0 : index
      %298 = vector.load %arg14[%297, %c0_115, %c0_116] : memref<2x1x32xf32, #tpu.memory_space<vmem>>, vector<1x1x32xf32>
      %299 = vector.shape_cast %298 : vector<1x1x32xf32> to vector<1x32xf32>
      %300 = arith.index_cast %arg22 : i32 to index
      %c0_117 = arith.constant 0 : index
      %c0_118 = arith.constant 0 : index
      %301 = vector.load %arg15[%300, %c0_117, %c0_118] : memref<2x1x32xf32, #tpu.memory_space<vmem>>, vector<1x1x32xf32>
      %302 = vector.shape_cast %301 : vector<1x1x32xf32> to vector<1x32xf32>
      %cst_119 = arith.constant dense<0.000000e+00> : vector<16xf32>
      %303 = vector.multi_reduction <add>, %296, %cst_119 [1] : vector<16x32xf32> to vector<16xf32>
      %304 = vector.shape_cast %303 : vector<16xf32> to vector<16x1xf32>
      %cst_120 = arith.constant 3.200000e+01 : f32
      %305 = vector.broadcast %cst_120 : f32 to vector<16x1xf32>
      %306 = arith.divf %304, %305 : vector<16x1xf32>
      %307 = vector.broadcast %306 : vector<16x1xf32> to vector<16x32xf32>
      %308 = arith.subf %296, %307 : vector<16x32xf32>
      %309 = arith.mulf %308, %308 : vector<16x32xf32>
      %cst_121 = arith.constant dense<0.000000e+00> : vector<16xf32>
      %310 = vector.multi_reduction <add>, %309, %cst_121 [1] : vector<16x32xf32> to vector<16xf32>
      %311 = vector.shape_cast %310 : vector<16xf32> to vector<16x1xf32>
      %cst_122 = arith.constant 3.200000e+01 : f32
      %312 = vector.broadcast %cst_122 : f32 to vector<16x1xf32>
      %313 = arith.divf %311, %312 : vector<16x1xf32>
      %314 = vector.broadcast %306 : vector<16x1xf32> to vector<16x32xf32>
      %315 = arith.subf %296, %314 : vector<16x32xf32>
      %cst_123 = arith.constant 9.99999996E-13 : f32
      %316 = vector.broadcast %cst_123 : f32 to vector<16x1xf32>
      %317 = arith.addf %313, %316 : vector<16x1xf32>
      %318 = math.rsqrt %317 : vector<16x1xf32>
      %319 = vector.broadcast %318 : vector<16x1xf32> to vector<16x32xf32>
      %320 = arith.mulf %315, %319 : vector<16x32xf32>
      %321 = vector.broadcast %299 : vector<1x32xf32> to vector<16x32xf32>
      %322 = arith.mulf %320, %321 : vector<16x32xf32>
      %323 = vector.broadcast %302 : vector<1x32xf32> to vector<16x32xf32>
      %324 = arith.addf %322, %323 : vector<16x32xf32>
      scf.yield %324 : vector<16x32xf32>
    }
    %c2_i32_9 = arith.constant 2 : i32
    %27 = vector.extract_strided_slice %26 {offsets = [0, 0], sizes = [1, 32], strides = [1, 1]} : vector<16x32xf32> to vector<1x32xf32>
    %28 = vector.extract_strided_slice %26 {offsets = [8, 0], sizes = [1, 32], strides = [1, 1]} : vector<16x32xf32> to vector<1x32xf32>
    %29 = tpu.concatenate %27, %28 in 0 : vector<1x32xf32>, vector<1x32xf32> -> vector<2x32xf32>
    %c0_10 = arith.constant 0 : index
    %c0_11 = arith.constant 0 : index
    %30 = vector.load %arg16[%c0_10, %c0_11] : memref<32x32xf32, #tpu.memory_space<vmem>>, vector<32x32xf32>
    %cst_12 = arith.constant dense<0.000000e+00> : vector<2x32xf32>
    %31 = tpu.matmul %29, %30, %cst_12 {dimension_numbers = #tpu.dot_dimension_numbers<[1], [0], [0], [1], [0, 0, 1, 1], [], []>} : vector<2x32xf32>, vector<32x32xf32>, vector<2x32xf32> -> vector<2x32xf32>
    %c0_13 = arith.constant 0 : index
    %c0_14 = arith.constant 0 : index
    %32 = vector.load %arg17[%c0_13, %c0_14] : memref<1x32xf32, #tpu.memory_space<vmem>>, vector<1x32xf32>
    %33 = vector.broadcast %32 : vector<1x32xf32> to vector<2x32xf32>
    %34 = arith.addf %31, %33 : vector<2x32xf32>
    %35 = math.tanh %34 : vector<2x32xf32>
    %c0_15 = arith.constant 0 : index
    %c0_16 = arith.constant 0 : index
    %36 = vector.load %arg18[%c0_15, %c0_16] : memref<32x3xf32, #tpu.memory_space<vmem>>, vector<32x3xf32>
    %cst_17 = arith.constant dense<0.000000e+00> : vector<2x3xf32>
    %37 = tpu.matmul %35, %36, %cst_17 {dimension_numbers = #tpu.dot_dimension_numbers<[1], [0], [0], [1], [0, 0, 1, 1], [], []>} : vector<2x32xf32>, vector<32x3xf32>, vector<2x3xf32> -> vector<2x3xf32>
    %c0_18 = arith.constant 0 : index
    %c0_19 = arith.constant 0 : index
    %38 = vector.load %arg19[%c0_18, %c0_19] : memref<1x3xf32, #tpu.memory_space<vmem>>, vector<1x3xf32>
    %39 = vector.broadcast %38 : vector<1x3xf32> to vector<2x3xf32>
    %40 = arith.addf %37, %39 : vector<2x3xf32>
    %c0_20 = arith.constant 0 : index
    %c0_21 = arith.constant 0 : index
    %41 = vector.load %arg20[%c0_20, %c0_21] : memref<2x3xf32, #tpu.memory_space<vmem>>, vector<2x3xf32>
    tpu.vector_store %arg20[%c0_20, %c0_21], %40 {strides = array<i32>} : memref<2x3xf32, #tpu.memory_space<vmem>>, vector<2x3xf32>,
    return
  }
}

</mosaic_0001>

<bundles_post_ra>
// kernel: tpu_custom_call.1
= control target key start
LH: loop header
LB: loop body
LE: loop exit
PB: predicated region body
PF: predicated region fallthrough
CT: control target
= control target key end

     0   :  { %s3771_s0 = inlined_call_operand.hbm [shape: f32[16,32], index: 0, kind: input, shape index: {}]   ;;  %s3772_s1 = inlined_call_operand.hbm [shape: f32[2,1,8], index: 1, kind: input, shape index: {}]   ;;  %s3773_s2 = inlined_call_operand.hbm [shape: f32[1,32], index: 2, kind: input, shape index: {}]   ;;  %s3774_s3 = inlined_call_operand.hbm [shape: f32[1,32], index: 3, kind: input, shape index: {}]   ;;  %s3775_s4 = inlined_call_operand.vmem [shape: f32[2,32,96], index: 4, kind: input, shape index: {}]   ;;  %s3776_s5 = inlined_call_operand.hbm [shape: f32[2,1,96], index: 5, kind: input, shape index: {}]   ;;  %s3777_s6 = inlined_call_operand.vmem [shape: f32[2,32,32], index: 6, kind: input, shape index: {}]   ;;  %s3778_s7 = inlined_call_operand.hbm [shape: f32[2,1,32], index: 7, kind: input, shape index: {}]   ;;  %s3779_s8 = inlined_call_operand.hbm [shape: f32[2,1,32], index: 8, kind: input, shape index: {}]   ;;  %s3780_s9 = inlined_call_operand.hbm [shape: f32[2,1,32], index: 9, kind: input, shape index: {}]   ;;  %s3781_s10 = inlined_call_operand.vmem [shape: f32[2,32,64], index: 10, kind: input, shape index: {}]   ;;  %s3782_s11 = inlined_call_operand.hbm [shape: f32[2,1,64], index: 11, kind: input, shape index: {}]   ;;  %s3783_s12 = inlined_call_operand.vmem [shape: f32[2,64,32], index: 12, kind: input, shape index: {}]   ;;  %s3784_s13 = inlined_call_operand.hbm [shape: f32[2,1,32], index: 13, kind: input, shape index: {}]   ;;  %s3785_s14 = inlined_call_operand.hbm [shape: f32[2,1,32], index: 14, kind: input, shape index: {}]   ;;  %s3786_s15 = inlined_call_operand.hbm [shape: f32[2,1,32], index: 15, kind: input, shape index: {}]   ;;  %s3787_s16 = inlined_call_operand.vmem [shape: f32[32,32], index: 16, kind: input, shape index: {}]   ;;  %s3788_s17 = inlined_call_operand.hbm [shape: f32[1,32], index: 17, kind: input, shape index: {}]   ;;  %s3789_s18 = inlined_call_operand.vmem [shape: f32[32,3], index: 18, kind: input, shape index: {}]   ;;  %s3790_s19 = inlined_call_operand.vmem [shape: f32[1,3], index: 19, kind: input, shape index: {}]   ;;  %s3791_s20 = inlined_call_operand.hbm [shape: f32[2,3], index: 20, kind: output, shape index: {}]  }
   0x1   :  { %3798 = sst [smem:[#allocation33_spill]] %s3771_s0 }
   0x2   :  { %3799 = sst [smem:[#allocation34_spill]] %s3772_s1 }
   0x3   :  { %3800 = sst [smem:[#allocation35_spill]] %s3773_s2 }
   0x4   :  { %3801 = sst [smem:[#allocation36_spill]] %s3774_s3 }
   0x5   :  { %3802 = sst [smem:[#allocation37_spill]] %s3775_s4 }
   0x6   :  { %3803 = sst [smem:[#allocation38_spill]] %s3789_s18 }
   0x7   :  { %3804 = sst [smem:[#allocation39_spill]] %s3790_s19 }
   0x8   :  { %3805 = sst [smem:[#allocation40_spill]] %s3791_s20 }
   0x9   :  { %25 = vsyncpa [#allocation4], 0 }
   0xa   :  { %26 = vsyncpa [#allocation7], 0 }
   0xb   :  { %27 = vsyncpa [#allocation10], 0 }
   0xc   :  { %28 = vsyncpa [#allocation13], 0 }
   0xd   :  { %29 = vsyncpa [#allocation16], 0 }
   0xe   :  { %30 = vsyncpa [#allocation19], 0 }
   0xf   :  { %31 = vsyncpa [#allocation22], 0 }
  0x10   :  { %32 = vsyncpa [#allocation5], 0  ;;  %s3185_s1 = smov [#allocation6]   ;;  %s3806_s2 = sld [smem:[#allocation34_spill]] }
  0x11   :  { %s50_s22 = sshll.u32 %s3185_s1, 4  ;;  %s51_s22 = int_to_ptr.vmem [resolvable:$true] %s50_s22 }
  0x16   :  { %s2837_s25 = scalar_lea.hbm %s3806_s2, 32 }
  0x17   :  { %p2838_p0 = scmp.ne.s32.totalorder %s3806_s2, %s2837_s25  ;;  %p2841_p1 = scmp.lt.u32.totalorder %s2837_s25, %s3806_s2 }
  0x19   :  { %p2843_p2 = pnand %p2841_p1, %p2838_p0 }
  0x1b   :  { %2846 = shalt.err (!%p2843_p2)
}
  0x1c   :  { %s2847_s4 = scalar_lea.vmem %s51_s22, 32  ;;  %p2852_p4 = scmp.lt.s32.totalorder %s51_s22, %s51_s22 }
  0x1d   :  { %p2848_p3 = scmp.ne.s32.totalorder %s51_s22, %s2847_s4  ;;  %p2853_p5 = scmp.lt.s32.totalorder %s2847_s4, %s2847_s4 }
  0x1f   :  { %p2854_p6 = por %p2853_p5, %p2852_p4 }
  0x21   :  { %p2855_p7 = pnand %p2854_p6, %p2848_p3 }
  0x23   :  { %2858 = shalt.err (!%p2855_p7)
}
  0x24   :  { %s3186_s29 = smov 16   ;;  %s3187_s30 = smov 1  }
  0x25   :  { %56 = dma.hbm_to_vmem [thread:$0]  %s3806_s2, 32, %s51_s22, [#allocation7], %s3186_s29, %s3186_s29, %s3187_s30  }
  0x26   :  { %s3188_s1 = smov [#allocation9]   ;;  %s3189_s24 = smov [#allocation12]  }
  0x27   :  { %s73_s23 = sshll.u32 %s3188_s1, 4  ;;  %s98_s25 = sshll.u32 %s3189_s24, 4  ;;  %s74_s23 = int_to_ptr.vmem [resolvable:$true] %s73_s23  ;;  %s99_s25 = int_to_ptr.vmem [resolvable:$true] %s98_s25 }
  0x28   :  { %s3807_s27 = sld [smem:[#allocation36_spill]] }
  0x2e   :  { %s2859_s28 = scalar_lea.hbm %s3807_s27, 16 }
  0x2f   :  { %p2860_p8 = scmp.ne.s32.totalorder %s3807_s27, %s2859_s28  ;;  %p2863_p9 = scmp.lt.u32.totalorder %s2859_s28, %s3807_s27 }
  0x31   :  { %p2865_p10 = pnand %p2863_p9, %p2860_p8 }
  0x33   :  { %2868 = shalt.err (!%p2865_p10)
}
  0x34   :  { %s2869_s22 = scalar_lea.vmem %s74_s23, 16  ;;  %s2873_s2 = scalar_lea.vmem %s74_s23, 32 }
  0x35   :  { %p2870_p11 = scmp.ne.s32.totalorder %s74_s23, %s2869_s22  ;;  %p2874_p12 = scmp.lt.s32.totalorder %s74_s23, %s74_s23 }
  0x36   :  { %p2875_p13 = scmp.lt.s32.totalorder %s2873_s2, %s2869_s22 }
  0x38   :  { %p2876_p0 = por %p2875_p13, %p2874_p12 }
  0x3a   :  { %p2877_p1 = pnand %p2876_p0, %p2870_p11 }
  0x3c   :  { %2880 = shalt.err (!%p2877_p1)
}
  0x3d   :  { %76 = dma.hbm_to_vmem [thread:$0]  %s3807_s27, 16, %s74_s23, [#allocation10]  }
  0x3e   :  { %s2881_s18 = scalar_lea.hbm %s3778_s7, 32 }
  0x3f   :  { %p2882_p2 = scmp.ne.s32.totalorder %s3778_s7, %s2881_s18  ;;  %p2885_p3 = scmp.lt.u32.totalorder %s2881_s18, %s3778_s7 }
  0x41   :  { %p2887_p4 = pnand %p2885_p3, %p2882_p2 }
  0x43   :  { %2890 = shalt.err (!%p2887_p4)
}
  0x44   :  { %s2891_s28 = scalar_lea.vmem %s99_s25, 32  ;;  %p2896_p6 = scmp.lt.s32.totalorder %s99_s25, %s99_s25 }
  0x45   :  { %p2892_p5 = scmp.ne.s32.totalorder %s99_s25, %s2891_s28  ;;  %p2897_p7 = scmp.lt.s32.totalorder %s2891_s28, %s2891_s28 }
  0x47   :  { %p2898_p8 = por %p2897_p7, %p2896_p6 }
  0x49   :  { %p2899_p9 = pnand %p2898_p8, %p2892_p5 }
  0x4b   :  { %2902 = shalt.err (!%p2899_p9)
}
  0x4c   :  { %104 = dma.hbm_to_vmem [thread:$0]  %s3778_s7, 32, %s99_s25, [#allocation13], %s3186_s29, %s3186_s29, %s3187_s30  }
  0x4d   :  { %s3190_s4 = smov [#allocation15]   ;;  %s3191_s2 = smov [#allocation18]  }
  0x4e   :  { %s122_s22 = sshll.u32 %s3190_s4, 4  ;;  %s150_s0 = sshll.u32 %s3191_s2, 4  ;;  %s123_s22 = int_to_ptr.vmem [resolvable:$true] %s122_s22  ;;  %s151_s0 = int_to_ptr.vmem [resolvable:$true] %s150_s0 }
  0x4f   :  { %s2903_s1 = scalar_lea.hbm %s3780_s9, 32 }
  0x50   :  { %p2904_p10 = scmp.ne.s32.totalorder %s3780_s9, %s2903_s1  ;;  %p2907_p11 = scmp.lt.u32.totalorder %s2903_s1, %s3780_s9 }
  0x52   :  { %p2909_p12 = pnand %p2907_p11, %p2904_p10 }
  0x54   :  { %2912 = shalt.err (!%p2909_p12)
}
  0x55   :  { %s2913_s7 = scalar_lea.vmem %s123_s22, 32  ;;  %p2918_p0 = scmp.lt.s32.totalorder %s123_s22, %s123_s22 }
  0x56   :  { %p2914_p13 = scmp.ne.s32.totalorder %s123_s22, %s2913_s7  ;;  %p2919_p1 = scmp.lt.s32.totalorder %s2913_s7, %s2913_s7 }
  0x58   :  { %p2920_p2 = por %p2919_p1, %p2918_p0 }
  0x5a   :  { %p2921_p3 = pnand %p2920_p2, %p2914_p13 }
  0x5c   :  { %2924 = shalt.err (!%p2921_p3)
}
  0x5d   :  { %128 = dma.hbm_to_vmem [thread:$0]  %s3780_s9, 32, %s123_s22, [#allocation16], %s3186_s29, %s3186_s29, %s3187_s30  }
  0x5e   :  { %s2925_s27 = scalar_lea.hbm %s3784_s13, 32 }
  0x5f   :  { %p2926_p4 = scmp.ne.s32.totalorder %s3784_s13, %s2925_s27  ;;  %p2929_p5 = scmp.lt.u32.totalorder %s2925_s27, %s3784_s13 }
  0x61   :  { %p2931_p6 = pnand %p2929_p5, %p2926_p4 }
  0x63   :  { %2934 = shalt.err (!%p2931_p6)
}
  0x64   :  { %s2935_s1 = scalar_lea.vmem %s151_s0, 32  ;;  %p2940_p8 = scmp.lt.s32.totalorder %s151_s0, %s151_s0 }
  0x65   :  { %p2936_p7 = scmp.ne.s32.totalorder %s151_s0, %s2935_s1  ;;  %p2941_p9 = scmp.lt.s32.totalorder %s2935_s1, %s2935_s1 }
  0x67   :  { %p2942_p10 = por %p2941_p9, %p2940_p8 }
  0x69   :  { %p2943_p11 = pnand %p2942_p10, %p2936_p7 }
  0x6b   :  { %2946 = shalt.err (!%p2943_p11)
}
  0x6c   :  { %156 = dma.hbm_to_vmem [thread:$0]  %s3784_s13, 32, %s151_s0, [#allocation19], %s3186_s29, %s3186_s29, %s3187_s30  }
  0x6d   :  { %s3192_s18 = smov [#allocation21]   ;;  %s3193_s24 = smov [#allocation3]  }
  0x6e   :  { %s174_s19 = sshll.u32 %s3192_s18, 4  ;;  %s38_s3 = sshll.u32 %s3193_s24, 4  ;;  %s175_s19 = int_to_ptr.vmem [resolvable:$true] %s174_s19  ;;  %s39_s3 = int_to_ptr.vmem [resolvable:$true] %s38_s3 }
  0x6f   :  { %s2947_s26 = scalar_lea.hbm %s3786_s15, 32 }
  0x70   :  { %p2948_p12 = scmp.ne.s32.totalorder %s3786_s15, %s2947_s26  ;;  %p2951_p13 = scmp.lt.u32.totalorder %s2947_s26, %s3786_s15 }
  0x72   :  { %p2953_p0 = pnand %p2951_p13, %p2948_p12 }
  0x74   :  { %2956 = shalt.err (!%p2953_p0)
}
  0x75   :  { %s2957_s13 = scalar_lea.vmem %s175_s19, 32  ;;  %p2962_p2 = scmp.lt.s32.totalorder %s175_s19, %s175_s19 }
  0x76   :  { %p2958_p1 = scmp.ne.s32.totalorder %s175_s19, %s2957_s13  ;;  %p2963_p3 = scmp.lt.s32.totalorder %s2957_s13, %s2957_s13 }
  0x78   :  { %p2964_p4 = por %p2963_p3, %p2962_p2 }
  0x7a   :  { %p2965_p5 = pnand %p2964_p4, %p2958_p1 }
  0x7c   :  { %2968 = shalt.err (!%p2965_p5)
}
  0x7d   :  { %180 = dma.hbm_to_vmem [thread:$0]  %s3786_s15, 32, %s175_s19, [#allocation22], %s3186_s29, %s3186_s29, %s3187_s30  }
  0x7e   :  { %s3808_s1 = sld [smem:[#allocation33_spill]] }
  0x84   :  { %s2969_s9 = scalar_lea.hbm %s3808_s1, 256 }
  0x85   :  { %p2970_p6 = scmp.ne.s32.totalorder %s3808_s1, %s2969_s9  ;;  %p2973_p7 = scmp.lt.u32.totalorder %s2969_s9, %s3808_s1 }
  0x87   :  { %p2975_p8 = pnand %p2973_p7, %p2970_p6 }
  0x89   :  { %2978 = shalt.err (!%p2975_p8)
}
  0x8a   :  { %s2979_s25 = scalar_lea.vmem %s39_s3, 256  ;;  %p2984_p10 = scmp.lt.s32.totalorder %s39_s3, %s39_s3 }
  0x8b   :  { %p2980_p9 = scmp.ne.s32.totalorder %s39_s3, %s2979_s25  ;;  %p2985_p11 = scmp.lt.s32.totalorder %s2979_s25, %s2979_s25 }
  0x8d   :  { %p2986_p12 = por %p2985_p11, %p2984_p10 }
  0x8f   :  { %p2987_p13 = pnand %p2986_p12, %p2980_p9 }
  0x91   :  { %2990 = shalt.err (!%p2987_p13)
}
  0x92   :  { %s3194_s15 = smov 128   ;;  %s3195_s19 = smov 8  }
  0x93   :  { %44 = dma.hbm_to_vmem [thread:$0]  %s3808_s1, 256, %s39_s3, [#allocation4], %s3194_s15, %s3194_s15, %s3195_s19  }
  0x94   :  { %s3196_s23 = smov [#allocation8]   ;;  %s3197_s4 = smov [#allocation11]  }
  0x95   :  { %s63_s27 = sshll.u32 %s3196_s23, 4  ;;  %s84_s13 = sshll.u32 %s3197_s4, 4  ;;  %s64_s27 = int_to_ptr.vmem [resolvable:$true] %s63_s27  ;;  %s85_s13 = int_to_ptr.vmem [resolvable:$true] %s84_s13 }
  0x96   :  { %s3809_s21 = sld [smem:[#allocation35_spill]] }
  0x9c   :  { %s2991_s20 = scalar_lea.hbm %s3809_s21, 16 }
  0x9d   :  { %p2992_p0 = scmp.ne.s32.totalorder %s3809_s21, %s2991_s20  ;;  %p2995_p1 = scmp.lt.u32.totalorder %s2991_s20, %s3809_s21 }
  0x9f   :  { %p2997_p2 = pnand %p2995_p1, %p2992_p0 }
  0xa1   :  { %3000 = shalt.err (!%p2997_p2)
}
  0xa2   :  { %s3001_s3 = scalar_lea.vmem %s64_s27, 16  ;;  %s3005_s1 = scalar_lea.vmem %s64_s27, 32 }
  0xa3   :  { %p3002_p3 = scmp.ne.s32.totalorder %s64_s27, %s3001_s3  ;;  %p3006_p4 = scmp.lt.s32.totalorder %s64_s27, %s64_s27 }
  0xa4   :  { %p3007_p5 = scmp.lt.s32.totalorder %s3005_s1, %s3001_s3 }
  0xa6   :  { %p3008_p6 = por %p3007_p5, %p3006_p4 }
  0xa8   :  { %p3009_p7 = pnand %p3008_p6, %p3002_p3 }
  0xaa   :  { %3012 = shalt.err (!%p3009_p7)
}
  0xab   :  { %66 = dma.hbm_to_vmem [thread:$0]  %s3809_s21, 16, %s64_s27, [#allocation7]  }
  0xac   :  { %s3013_s26 = scalar_lea.hbm %s3776_s5, 32 }
  0xad   :  { %p3014_p8 = scmp.ne.s32.totalorder %s3776_s5, %s3013_s26  ;;  %p3017_p9 = scmp.lt.u32.totalorder %s3013_s26, %s3776_s5 }
  0xaf   :  { %p3019_p10 = pnand %p3017_p9, %p3014_p8 }
  0xb1   :  { %3022 = shalt.err (!%p3019_p10)
}
  0xb2   :  { %s3023_s2 = scalar_lea.vmem %s85_s13, 32  ;;  %p3028_p12 = scmp.lt.s32.totalorder %s85_s13, %s85_s13 }
  0xb3   :  { %p3024_p11 = scmp.ne.s32.totalorder %s85_s13, %s3023_s2  ;;  %p3029_p13 = scmp.lt.s32.totalorder %s3023_s2, %s3023_s2 }
  0xb5   :  { %p3030_p0 = por %p3029_p13, %p3028_p12 }
  0xb7   :  { %p3031_p1 = pnand %p3030_p0, %p3024_p11 }
  0xb9   :  { %3034 = shalt.err (!%p3031_p1)
}
  0xba   :  { %90 = dma.hbm_to_vmem [thread:$0]  %s3776_s5, 32, %s85_s13, [#allocation10], %s3186_s29, %s3186_s29, %s3187_s30  }
  0xbb   :  { %s3198_s20 = smov [#allocation14]   ;;  %s3199_s22 = smov [#allocation17]  }
  0xbc   :  { %s110_s9 = sshll.u32 %s3198_s20, 4  ;;  %s136_s18 = sshll.u32 %s3199_s22, 4  ;;  %s111_s9 = int_to_ptr.vmem [resolvable:$true] %s110_s9  ;;  %s137_s18 = int_to_ptr.vmem [resolvable:$true] %s136_s18 }
  0xbd   :  { %s3035_s1 = scalar_lea.hbm %s3779_s8, 32 }
  0xbe   :  { %p3036_p2 = scmp.ne.s32.totalorder %s3779_s8, %s3035_s1  ;;  %p3039_p3 = scmp.lt.u32.totalorder %s3035_s1, %s3779_s8 }
  0xc0   :  { %p3041_p4 = pnand %p3039_p3, %p3036_p2 }
  0xc2   :  { %3044 = shalt.err (!%p3041_p4)
}
  0xc3   :  { %s3045_s5 = scalar_lea.vmem %s111_s9, 32  ;;  %p3050_p6 = scmp.lt.s32.totalorder %s111_s9, %s111_s9 }
  0xc4   :  { %p3046_p5 = scmp.ne.s32.totalorder %s111_s9, %s3045_s5  ;;  %p3051_p7 = scmp.lt.s32.totalorder %s3045_s5, %s3045_s5 }
  0xc6   :  { %p3052_p8 = por %p3051_p7, %p3050_p6 }
  0xc8   :  { %p3053_p9 = pnand %p3052_p8, %p3046_p5 }
  0xca   :  { %3056 = shalt.err (!%p3053_p9)
}
  0xcb   :  { %116 = dma.hbm_to_vmem [thread:$0]  %s3779_s8, 32, %s111_s9, [#allocation13], %s3186_s29, %s3186_s29, %s3187_s30  }
  0xcc   :  { %s3057_s4 = scalar_lea.hbm %s3782_s11, 32 }
  0xcd   :  { %p3058_p10 = scmp.ne.s32.totalorder %s3782_s11, %s3057_s4  ;;  %p3061_p11 = scmp.lt.u32.totalorder %s3057_s4, %s3782_s11 }
  0xcf   :  { %p3063_p12 = pnand %p3061_p11, %p3058_p10 }
  0xd1   :  { %3066 = shalt.err (!%p3063_p12)
}
  0xd2   :  { %s3067_s20 = scalar_lea.vmem %s137_s18, 32  ;;  %p3072_p0 = scmp.lt.s32.totalorder %s137_s18, %s137_s18 }
  0xd3   :  { %p3068_p13 = scmp.ne.s32.totalorder %s137_s18, %s3067_s20  ;;  %p3073_p1 = scmp.lt.s32.totalorder %s3067_s20, %s3067_s20 }
  0xd5   :  { %p3074_p2 = por %p3073_p1, %p3072_p0 }
  0xd7   :  { %p3075_p3 = pnand %p3074_p2, %p3068_p13 }
  0xd9   :  { %3078 = shalt.err (!%p3075_p3)
}
  0xda   :  { %142 = dma.hbm_to_vmem [thread:$0]  %s3782_s11, 32, %s137_s18, [#allocation16], %s3186_s29, %s3186_s29, %s3187_s30  }
  0xdb   :  { %s3200_s22 = smov [#allocation20]   ;;  %s3201_s3 = smov [#allocation23]  }
  0xdc   :  { %s162_s24 = sshll.u32 %s3200_s22, 4  ;;  %s189_s1 = sshll.u32 %s3201_s3, 4  ;;  %s163_s24 = int_to_ptr.vmem [resolvable:$true] %s162_s24  ;;  %s190_s1 = int_to_ptr.vmem [resolvable:$true] %s189_s1 }
  0xdd   :  { %s3079_s15 = scalar_lea.hbm %s3785_s14, 32 }
  0xde   :  { %p3080_p4 = scmp.ne.s32.totalorder %s3785_s14, %s3079_s15  ;;  %p3083_p5 = scmp.lt.u32.totalorder %s3079_s15, %s3785_s14 }
  0xe0   :  { %p3085_p6 = pnand %p3083_p5, %p3080_p4 }
  0xe2   :  { %3088 = shalt.err (!%p3085_p6)
}
  0xe3   :  { %s3089_s11 = scalar_lea.vmem %s163_s24, 32  ;;  %p3094_p8 = scmp.lt.s32.totalorder %s163_s24, %s163_s24 }
  0xe4   :  { %p3090_p7 = scmp.ne.s32.totalorder %s163_s24, %s3089_s11  ;;  %p3095_p9 = scmp.lt.s32.totalorder %s3089_s11, %s3089_s11 }
  0xe6   :  { %p3096_p10 = por %p3095_p9, %p3094_p8 }
  0xe8   :  { %p3097_p11 = pnand %p3096_p10, %p3090_p7 }
  0xea   :  { %3100 = shalt.err (!%p3097_p11)
}
  0xeb   :  { %168 = dma.hbm_to_vmem [thread:$0]  %s3785_s14, 32, %s163_s24, [#allocation19], %s3186_s29, %s3186_s29, %s3187_s30  }
  0xec   :  { %s3101_s0 = scalar_lea.hbm %s3788_s17, 16 }
  0xed   :  { %p3102_p12 = scmp.ne.s32.totalorder %s3788_s17, %s3101_s0  ;;  %p3105_p13 = scmp.lt.u32.totalorder %s3101_s0, %s3788_s17 }
  0xef   :  { %p3107_p0 = pnand %p3105_p13, %p3102_p12 }
  0xf1   :  { %3110 = shalt.err (!%p3107_p0)
}
  0xf2   :  { %s3111_s8 = scalar_lea.vmem %s190_s1, 16  ;;  %s3115_s9 = scalar_lea.vmem %s190_s1, 32 }
  0xf3   :  { %p3112_p1 = scmp.ne.s32.totalorder %s190_s1, %s3111_s8  ;;  %p3116_p2 = scmp.lt.s32.totalorder %s190_s1, %s190_s1 }
  0xf4   :  { %p3117_p3 = scmp.lt.s32.totalorder %s3115_s9, %s3111_s8 }
  0xf6   :  { %p3118_p4 = por %p3117_p3, %p3116_p2 }
  0xf8   :  { %p3119_p5 = pnand %p3118_p4, %p3112_p1 }
  0xfa   :  { %3122 = shalt.err (!%p3119_p5)
}
  0xfb   :  { %192 = dma.hbm_to_vmem [thread:$0]  %s3788_s17, 16, %s190_s1, [#allocation22]  }
  0xfc   :  { %3157 = dma.done.wait [#allocation4], 256  }
  0xfd   :  { %3158 = vsyncadd [#allocation4], 4294967040 }
  0xfe   :  { %3159 = dma.done.wait [#allocation7], 48  }
  0xff   :  { %3160 = vsyncadd [#allocation7], 4294967248 }
 0x100   :  { %3161 = dma.done.wait [#allocation10], 48  }
 0x101   :  { %3162 = vsyncadd [#allocation10], 4294967248 }
 0x102   :  { %3163 = dma.done.wait [#allocation13], 64  }
 0x103   :  { %3164 = vsyncadd [#allocation13], 4294967232 }
 0x104   :  { %3165 = dma.done.wait [#allocation16], 64  }
 0x105   :  { %3166 = vsyncadd [#allocation16], 4294967232 }
 0x106   :  { %3167 = dma.done.wait [#allocation19], 64  }
 0x107   :  { %3168 = vsyncadd [#allocation19], 4294967232 }
 0x108   :  { %3169 = dma.done.wait [#allocation22], 48  }
 0x109   :  { %3170 = vsyncadd [#allocation22], 4294967248  ;;  %vm240_vm0 = vcmask 261120   ;;  %v236_v0 = vld [vmem:[#allocation3] sm:$0xff]  ;;  %v237_v1 = vld [vmem:[#allocation3 + $0x8] sm:$0xff]  ;;  %s3518_s17 = smov 0  }
 0x10a   :  { %v241_v2 = vsel %vm240_vm0, %v236_v0, 0.0  ;;  %v244_v3 = vsel %vm240_vm0, %v237_v1, 0.0  ;;  %v2400_v21 = vld [vmem:[#allocation8] ss:$0 sm:$0xff]  ;;  %v2401_v23 = vld [vmem:[#allocation9] ss:$0 sm:$0xff] }
 0x10b   :  { %242 = vadd.xlane.f32.xlu0 %v241_v2 }
 0x10f   :  { %245 = vadd.xlane.f32.xlu0 %v244_v3 }
 0x198   :  { %v243_v4 = vpop.xlane.xlu0 %242 }
 0x199   :  { %v248_v5 = vmul.f32 0.03125, %v243_v4 }
 0x19b   :  { %v250_v6 = vsub.f32 %v236_v0, %v248_v5 }
 0x19c   :  { %v246_v7 = vpop.xlane.xlu0 %245 }
 0x19d   :  { %v249_v8 = vmul.f32 0.03125, %v246_v7  ;;  %v252_v9 = vmul.f32 %v250_v6, %v250_v6 }
 0x19f   :  { %v251_v10 = vsub.f32 %v237_v1, %v249_v8  ;;  %v254_v11 = vsel %vm240_vm0, %v252_v9, 0.0 }
 0x1a0   :  { %255 = vadd.xlane.f32.xlu1 %v254_v11 }
 0x1a1   :  { %v253_v12 = vmul.f32 %v251_v10, %v251_v10 }
 0x1a3   :  { %v257_v13 = vsel %vm240_vm0, %v253_v12, 0.0 }
 0x1a4   :  { %258 = vadd.xlane.f32.xlu1 %v257_v13 }
 0x22d   :  { %v256_v14 = vpop.xlane.xlu1 %255 }
 0x22e   :  { %v260_v15 = vmul.f32 0.03125, %v256_v14 }
 0x230   :  { %v262_v16 = vadd.f32 1e-12, %v260_v15 }
 0x231   :  { %v259_v17 = vpop.xlane.xlu1 %258 }
 0x232   :  { %2787 = vrsqrt.f32 %v262_v16  ;;  %v261_v18 = vmul.f32 0.03125, %v259_v17 }
 0x234   :  { %v263_v19 = vadd.f32 1e-12, %v261_v18 }
 0x236   :  { %2789 = vrsqrt.f32 %v263_v19 }
 0x23c   :  { %v2788_v20 = vpop.eup %2787 }
 0x23d   :  { %v266_v22 = vmul.f32 %v2788_v20, %v250_v6 }
 0x23f   :  { %v274_v24 = vmul.f32 %v2400_v21, %v266_v22 }
 0x240   :  { %v2790_v25 = vpop.eup %2789 }
 0x241   :  { %v282_v26 = vadd.f32 %v2401_v23, %v274_v24   ;;  %v267_v27 = vmul.f32 %v2790_v25, %v251_v10 }
 0x243   :  { %v275_v28 = vmul.f32 %v2400_v21, %v267_v27 }
 0x245   :  { %v283_v29 = vadd.f32 %v2401_v23, %v275_v28  }
 0x246 LB: > { %s3530_s30 = sshll.u32 %s3183_s17, 5  ;;  %2528 = vmatprep.mubr.msk.f32.mxu1 %vm240_vm0, %v3179_v26  ;;  %s3810_s3 = sld [smem:[#allocation37_spill]]  ;;  %v3202_v36 = vmov 0.0   ;;  %vm3203_vm1 = vmmov 0   ;;  %vm391_vm2 = vcmask 64512   ;;  %vm733_vm3 = vcmask 130112   ;;  %s3183_s17 = sphi %s3518_s17, %s289_s17   ;;  %v3179_v26 = vphi %v282_v26, %v3812_v26   ;;  %v3175_v29 = vphi %v283_v29, %v3811_v29  }
 0x247   : > { %2541 = vmatprep.subr.mxu0 %v3202_v36  ;;  %2543 = vmatprep.mubr.msk.f32.mxu0 %vm3203_vm1, %v3202_v36  ;;  %s298_s7 = scalar_lea.vmem [#allocation11], %s3183_s17  ;;  %s3204_s25 = smov 120   ;;  %v2408_v58 = vld [vmem:[#allocation6] ss:$0 sm:$0xff]  ;;  %v2421_v14 = vld [vmem:[#allocation6 + $0x1] ss:$0 sm:$0xff] }
 0x248   : > { %v2403_v37 = vld [vmem:[%s298_s7] ss:$0 sm:$0xff]  ;;  %s3205_s15 = smov 96   ;;  %s3206_s19 = smov 80   ;;  %vm906_vm4 = vcmask 195712   ;;  %vm1079_vm5 = vcmask 261312  }
 0x249   : > { %s3207_s5 = smov 88   ;;  %s3208_s13 = smov 72   ;;  %vm2046_vm6 = vcmask 523264  }
 0x24a   : > { %s3209_s26 = smov 112   ;;  %s3210_s11 = smov 104  }
 0x24b   : > { %s3211_s18 = smov 56   ;;  %s3212_s28 = smov 64  }
 0x24c   : > { %s293_s1 = scalar_lea.vmem %s3810_s3, %s3530_s30  ;;  %s3213_s23 = smov 40  }
 0x24d   : > { %v294_v30 = vld [vmem:[%s293_s1] sm:$0xff]  ;;  %v295_v31 = vld [vmem:[%s293_s1 + $0x8] sm:$0xff]  ;;  %v296_v32 = vld [vmem:[%s293_s1 + $0x10] sm:$0xff]  ;;  %s3214_s4 = smov 48   ;;  %s3215_s0 = smov 8  }
 0x24e   : > { %v2674_v33 = vpack.c.bf16 %v295_v31, %v294_v30  ;;  %v297_v34 = vld [vmem:[%s293_s1 + $0x18] sm:$0xff]  ;;  %s3216_s2 = smov 16   ;;  %s3217_s27 = smov 24  }
 0x24f   : > { %v2678_v35 = vpack.c.bf16 %v297_v34, %v296_v32  ;;  %s1774_s8 = scalar_lea.vmem %s3777_s6, %s3530_s30  ;;  %s1779_s9 = scalar_lea.vmem [#allocation12], %s3183_s17 }
 0x250   : > { %2675 = vmatprep.subr.bf16.mxu1 %v2674_v33  ;;  %s1916_s22 = scalar_lea.vmem %s3781_s10, %s3530_s30  ;;  %s1870_s30 = scalar_lea.vmem [#allocation14], %s3183_s17 }
 0x251   : > { %2677 = vmatpush3.bf16.msra.mxu1 %v2674_v33  ;;  %s1872_s24 = scalar_lea.vmem [#allocation15], %s3183_s17  ;;  %s2440_s3 = sshll.u32 %s3183_s17, 6 }
 0x252   : > { %2679 = vmatprep.subr.bf16.mxu1 %v2678_v35 }
 0x255   : > { %2681 = vmatpush3.bf16.msra.mxu1 %v2678_v35 }
 0x256   : > { %2531 = vmatprep.subr.mxu1 %v3202_v36 }
 0x258   : > { %2529 = vmatmul.mubr.msk.f32.vlgmr.msra.gmra.mrb[0].mxu1 %vm240_vm0, %v3175_v29 }
 0x259   : > { %2533 = vmatprep.mubr.msk.f32.mxu1 %vm3203_vm1, %v3202_v36 }
 0x32b   : > { %v2530_v38 = vpop.f32.mrb[0].mxu1 }
 0x32c   : > { %v378_v39 = vpop.f32.mrb[1].mxu1  ;;  %v3555_v41 = vadd.f32 %v2530_v38, %v2403_v37 }
 0x32d   : > { %v3547_v40 = vadd.f32 %v2403_v37, %v378_v39 }
 0x32f   : > { %562 = vrot.lane.b32.xlu1 %v3547_v40, %s3204_s25  ;;  %389 = vrot.lane.b32.xlu0 %v3547_v40, %s3205_s15 }
 0x333   : > { %737 = vrot.lane.b32.xlu1 %v3547_v40, %s3206_s19  ;;  %564 = vrot.lane.b32.xlu0 %v3547_v40, %s3207_s5 }
 0x337   : > { %910 = vrot.lane.b32.xlu1 %v3547_v40, %s3208_s13  ;;  %735 = vrot.lane.b32.xlu0 %v3547_v40, %s3209_s26 }
 0x33b   : > { %1084 = vrot.lane.b32.xlu1 %v3555_v41, %s3205_s15  ;;  %908 = vrot.lane.b32.xlu0 %v3547_v40, %s3210_s11  ;;  %s1921_s15 = scalar_lea.vmem [#allocation17], %s3183_s17 }
 0x33f   : > { %1256 = vrot.lane.b32.xlu1 %v3555_v41, %s3204_s25  ;;  %1258 = vrot.lane.b32.xlu0 %v3555_v41, %s3207_s5  ;;  %s2029_s25 = scalar_lea.vmem %s3783_s12, %s2440_s3  ;;  %s2130_s5 = scalar_lea.vmem [#allocation20], %s3183_s17 }
 0x343   : > { %1428 = vrot.lane.b32.xlu1 %v3555_v41, %s3209_s26  ;;  %1430 = vrot.lane.b32.xlu0 %v3555_v41, %s3206_s19  ;;  %s2038_s19 = scalar_lea.vmem [#allocation18], %s3183_s17 }
 0x347   : > { %1600 = vrot.lane.b32.xlu1 %v3555_v41, %s3210_s11  ;;  %1602 = vrot.lane.b32.xlu0 %v3555_v41, %s3208_s13  ;;  %s2132_s13 = scalar_lea.vmem [#allocation21], %s3183_s17  ;;  %s289_s17 = sadd.s32 1, %s3183_s17  }
 0x348   : > { %p286_p6 = scmp.ge.s32.totalorder %s289_s17, 2  }
 0x349   :  { %vm3219_vm7 = vmmov (%p286_p6), 0   ;;  %vm2179_vm8 = vcmask (%p286_p6), 1040384   ;;  %s3813_s12 = sld [smem:[#allocation38_spill]] (%p286_p6)  ;;  %s3814_s29 = sld [smem:[#allocation39_spill]] (%p286_p6)  ;;  %vm2350_vm9 = vcmask (%p286_p6), 17408  }
 0x34b   : > { %653 = vrot.lane.b32.xlu1 %v3547_v40, %s3211_s18  ;;  %485 = vrot.lane.b32.xlu0 %v3547_v40, %s3212_s28 }
 0x3a1   : > { %v563_v42 = vpop.permute.xlu1 %562  ;;  %v390_v43 = vpop.permute.xlu0 %389 }
 0x3a2   : > { %2532 = vmatpush3.xpose.msk.msra.mxu1 %vm391_vm2, %v390_v43 }
 0x3a3   : > { %2536 = vmatprep.subr.mxu1 %v3202_v36 }
 0x3a5   : > { %v738_v44 = vpop.permute.xlu1 %737  ;;  %2534 = vmatmul.mubr.msk.f32.vlgmr.msra.gmra.mrb[2].mxu1 %vm391_vm2, %v3547_v40  ;;  %v565_v45 = vpop.permute.xlu0 %564 }
 0x3a6   : > { %2542 = vmatpush3.xpose.msk.msra.mxu0 %vm391_vm2, %v565_v45  ;;  %2538 = vmatprep.mubr.msk.f32.mxu1 %vm3203_vm1, %v3202_v36 }
 0x3a7   : > { %2551 = vmatprep.subr.mxu0 %v3202_v36 }
 0x3a9   : > { %v911_v46 = vpop.permute.xlu1 %910  ;;  %2544 = vmatmul.mubr.msk.f32.vlgmr.msra.gmra.mrb[0].mxu0 %vm391_vm2, %v563_v42  ;;  %v736_v47 = vpop.permute.xlu0 %735 }
 0x3aa   : > { %2552 = vmatpush3.xpose.msk.msra.mxu0 %vm391_vm2, %v738_v44  ;;  %2553 = vmatprep.mubr.msk.f32.mxu0 %vm3203_vm1, %v3202_v36 }
 0x3ab   : > { %2561 = vmatprep.subr.mxu0 %v3202_v36 }
 0x3ad   : > { %2554 = vmatmul.mubr.msk.f32.vlgmr.msra.gmra.mrb[2].mxu0 %vm391_vm2, %v736_v47  ;;  %v909_v48 = vpop.permute.xlu0 %908  ;;  %v1085_v49 = vpop.permute.xlu1 %1084 }
 0x3ae   : > { %2562 = vmatpush3.xpose.msk.msra.mxu0 %vm391_vm2, %v911_v46  ;;  %2563 = vmatprep.mubr.msk.f32.mxu0 %vm3203_vm1, %v3202_v36 }
 0x3af   : > { %2571 = vmatprep.subr.mxu0 %v3202_v36 }
 0x3b1   : > { %2564 = vmatmul.mubr.msk.f32.vlgmr.msra.gmra.mrb[4].mxu0 %vm391_vm2, %v909_v48  ;;  %v1259_v50 = vpop.permute.xlu0 %1258  ;;  %v1257_v51 = vpop.permute.xlu1 %1256 }
 0x3b2   : > { %2572 = vmatpush3.xpose.msk.msra.mxu0 %vm391_vm2, %v1085_v49  ;;  %2573 = vmatprep.mubr.msk.f32.mxu0 %vm3203_vm1, %v3202_v36 }
 0x3b3   : > { %2581 = vmatprep.subr.mxu0 %v3202_v36 }
 0x3b5   : > { %2574 = vmatmul.mubr.msk.f32.vlgmr.msra.gmra.mrb[6].mxu0 %vm391_vm2, %v3555_v41  ;;  %v1431_v52 = vpop.permute.xlu0 %1430  ;;  %v1429_v54 = vpop.permute.xlu1 %1428 }
 0x3b6   : > { %2582 = vmatpush3.xpose.msk.msra.mxu0 %vm391_vm2, %v1259_v50  ;;  %2583 = vmatprep.mubr.msk.f32.mxu0 %vm3203_vm1, %v3202_v36 }
 0x3b7   : > { %2591 = vmatprep.subr.mxu0 %v3202_v36 }
 0x3b9   : > { %2584 = vmatmul.mubr.msk.f32.vlgmr.msra.gmra.mrb[8].mxu0 %vm391_vm2, %v1257_v51  ;;  %v1603_v53 = vpop.permute.xlu0 %1602  ;;  %v1601_v56 = vpop.permute.xlu1 %1600 }
 0x3ba   : > { %2592 = vmatpush3.xpose.msk.msra.mxu0 %vm391_vm2, %v1431_v52  ;;  %2593 = vmatprep.mubr.msk.f32.mxu0 %vm3203_vm1, %v3202_v36 }
 0x3bb   : > { %2601 = vmatprep.subr.mxu0 %v3202_v36 }
 0x3bd   : > { %2594 = vmatmul.mubr.msk.f32.vlgmr.msra.gmra.mrb[10].mxu0 %vm391_vm2, %v1429_v54  ;;  %v486_v55 = vpop.permute.xlu0 %485  ;;  %v3621_v38 = vpop.permute.xlu1 %653 }
 0x3be   : > { %2537 = vmatpush3.msra.mxu1 %v486_v55  ;;  %2602 = vmatpush3.xpose.msk.msra.mxu0 %vm391_vm2, %v1603_v53 }
 0x3bf   : > { %2603 = vmatprep.mubr.msk.f32.mxu0 %vm3203_vm1, %v3202_v36  ;;  %2546 = vmatprep.subr.mxu1 %v3202_v36 }
 0x3c1   : > { %2604 = vmatmul.mubr.msk.f32.vlgmr.msra.gmra.mrb[12].mxu0 %vm391_vm2, %v1601_v56 }
 0x478   : > { %v462_v57 = vpop.f32.mrb[2].mxu1 }
 0x479   : > { %v466_v59 = vmul.f32 0.35355338, %v462_v57  ;;  %v2535_v60 = vpop.f32.mrb[3].mxu1 }
 0x47b   : > { %v473_v61 = vadd.f32 %v2408_v58, %v466_v59 }
 0x47c   : > { %v636_v62 = vpop.f32.mrb[0].mxu0 }
 0x47d   : > { %v640_v63 = vmul.f32 0.35355338, %v636_v62  ;;  %v2545_v0 = vpop.f32.mrb[1].mxu0  ;;  %v474_v1 = vsel %vm391_vm2, %v473_v61, -inf }
 0x47e   : > { %475 = vmax.xlane.f32.xlu0 %v474_v1 }
 0x47f   : > { %v641_v2 = vadd.f32 %v2408_v58, %v640_v63 }
 0x480   : > { %v809_v3 = vpop.f32.mrb[2].mxu0 }
 0x481   : > { %v813_v4 = vmul.f32 0.35355338, %v809_v3  ;;  %v2555_v5 = vpop.f32.mrb[3].mxu0  ;;  %v642_v6 = vsel %vm391_vm2, %v641_v2, -inf }
 0x482   : > { %643 = vmax.xlane.f32.xlu1 %v642_v6 }
 0x483   : > { %v814_v7 = vadd.f32 %v2408_v58, %v813_v4 }
 0x484   : > { %v982_v8 = vpop.f32.mrb[4].mxu0 }
 0x485   : > { %v986_v9 = vmul.f32 0.35355338, %v982_v8  ;;  %v2565_v10 = vpop.f32.mrb[5].mxu0  ;;  %v815_v11 = vsel %vm391_vm2, %v814_v7, -inf }
 0x486   : > { %816 = vmax.xlane.f32.xlu0 %v815_v11 }
 0x487   : > { %v987_v12 = vadd.f32 %v2408_v58, %v986_v9 }
 0x488   : > { %v1156_v13 = vpop.f32.mrb[6].mxu0 }
 0x489   : > { %v1160_v15 = vmul.f32 0.35355338, %v1156_v13  ;;  %v2575_v16 = vpop.f32.mrb[7].mxu0  ;;  %v988_v17 = vsel %vm391_vm2, %v987_v12, -inf }
 0x48a   : > { %989 = vmax.xlane.f32.xlu0 %v988_v17 }
 0x48b   : > { %v1167_v18 = vadd.f32 %v2421_v14, %v1160_v15 }
 0x48c   : > { %v1330_v19 = vpop.f32.mrb[8].mxu0 }
 0x48d   : > { %v1334_v20 = vmul.f32 0.35355338, %v1330_v19  ;;  %v2585_v21 = vpop.f32.mrb[9].mxu0  ;;  %v1168_v22 = vsel %vm391_vm2, %v1167_v18, -inf }
 0x48e   : > { %1169 = vmax.xlane.f32.xlu1 %v1168_v22 }
 0x48f   : > { %v1335_v23 = vadd.f32 %v2421_v14, %v1334_v20 }
 0x490   : > { %v1502_v24 = vpop.f32.mrb[10].mxu0 }
 0x491   : > { %v1506_v25 = vmul.f32 0.35355338, %v1502_v24  ;;  %v2595_v27 = vpop.f32.mrb[11].mxu0  ;;  %v1336_v28 = vsel %vm391_vm2, %v1335_v23, -inf }
 0x492   : > { %1337 = vmax.xlane.f32.xlu0 %v1336_v28 }
 0x493   : > { %v1507_v30 = vadd.f32 %v2421_v14, %v1506_v25 }
 0x494   : > { %v1674_v31 = vpop.f32.mrb[12].mxu0 }
 0x495   : > { %v1678_v32 = vmul.f32 0.35355338, %v1674_v31  ;;  %v2605_v33 = vpop.f32.mrb[13].mxu0  ;;  %v1508_v34 = vsel %vm391_vm2, %v1507_v30, -inf }
 0x496   : > { %1509 = vmax.xlane.f32.xlu1 %v1508_v34 }
 0x497   : > { %v1679_v35 = vadd.f32 %v2421_v14, %v1678_v32 }
 0x499   : > { %v1680_v37 = vsel %vm391_vm2, %v1679_v35, -inf }
 0x49a   : > { %1681 = vmax.xlane.f32.xlu0 %v1680_v37 }
 0x4a7   : > { %999 = vrot.lane.b32.xlu1 %v3547_v40, %s3213_s23 }
 0x4b0   : > { %826 = vrot.lane.b32.xlu0 %v3547_v40, %s3214_s4 }
 0x50b   : > { %v476_v39 = vpop.xlane.xlu0 %475 }
 0x50c   : > { %v477_v42 = vsub.f32 %v473_v61, %v476_v39 }
 0x50e   : > { %v478_v43 = vmul.f32 1.442695, %v477_v42 }
 0x50f   : > { %v644_v44 = vpop.xlane.xlu1 %643 }
 0x510   : > { %2791 = vpow2.f32 %v478_v43  ;;  %v645_v45 = vsub.f32 %v641_v2, %v644_v44 }
 0x512   : > { %v646_v46 = vmul.f32 1.442695, %v645_v45 }
 0x513   : > { %v817_v47 = vpop.xlane.xlu0 %816 }
 0x514   : > { %2793 = vpow2.f32 %v646_v46  ;;  %v818_v48 = vsub.f32 %v814_v7, %v817_v47 }
 0x516   : > { %v819_v49 = vmul.f32 1.442695, %v818_v48 }
 0x517   : > { %v990_v50 = vpop.xlane.xlu0 %989 }
 0x518   : > { %2795 = vpow2.f32 %v819_v49  ;;  %v991_v51 = vsub.f32 %v987_v12, %v990_v50 }
 0x51a   : > { %v2792_v52 = vpop.eup %2791  ;;  %v992_v53 = vmul.f32 1.442695, %v991_v51 }
 0x51b   : > { %v480_v40 = vsel %vm391_vm2, %v2792_v52, 0.0  ;;  %v1170_v60 = vpop.xlane.xlu1 %1169 }
 0x51c   : > { %2797 = vpow2.f32 %v992_v53  ;;  %481 = vadd.xlane.f32.xlu1 %v480_v40  ;;  %v1171_v61 = vsub.f32 %v1167_v18, %v1170_v60 }
 0x51e   : > { %v2794_v54 = vpop.eup %2793  ;;  %v1172_v1 = vmul.f32 1.442695, %v1171_v61  ;;  %v1777_v61 = vld [vmem:[%s1774_s8 + $0x10] sm:$0xff] }
 0x51f   : > { %v648_v55 = vsel %vm391_vm2, %v2794_v54, 0.0  ;;  %v1338_v62 = vpop.xlane.xlu0 %1337 }
 0x520   : > { %649 = vadd.xlane.f32.xlu0 %v648_v55  ;;  %v1339_v0 = vsub.f32 %v1335_v23, %v1338_v62  ;;  %2799 = vpow2.f32 %v1172_v1  ;;  %v1778_v62 = vld [vmem:[%s1774_s8 + $0x18] sm:$0xff] }
 0x522   : > { %v2796_v56 = vpop.eup %2795  ;;  %v1340_v4 = vmul.f32 1.442695, %v1339_v0 }
 0x523   : > { %v821_v57 = vsel %vm391_vm2, %v2796_v56, 0.0  ;;  %v1510_v63 = vpop.xlane.xlu1 %1509 }
 0x524   : > { %822 = vadd.xlane.f32.xlu1 %v821_v57  ;;  %v1511_v2 = vsub.f32 %v1507_v30, %v1510_v63  ;;  %2801 = vpow2.f32 %v1340_v4  ;;  %v1776_v57 = vld [vmem:[%s1774_s8 + $0x8] sm:$0xff]  ;;  %v2686_v63 = vpack.c.bf16 %v1778_v62, %v1777_v61  ;;  %v2034_v61 = vld [vmem:[%s2029_s25 + $0x20] sm:$0xff] }
 0x525   : > { %v2035_v62 = vld [vmem:[%s2029_s25 + $0x28] sm:$0xff] }
 0x526   : > { %v3626_v58 = vpop.eup %2797  ;;  %v1512_v5 = vmul.f32 1.442695, %v1511_v2 }
 0x527   : > { %v994_v59 = vsel %vm391_vm2, %v3626_v58, 0.0  ;;  %v1682_v3 = vpop.xlane.xlu0 %1681  ;;  %v1000_v16 = vpop.permute.xlu1 %999 }
 0x528   : > { %995 = vadd.xlane.f32.xlu0 %v994_v59  ;;  %v1683_v6 = vsub.f32 %v1679_v35, %v1682_v3  ;;  %2803 = vpow2.f32 %v1512_v5 }
 0x52a   : > { %v1684_v7 = vmul.f32 1.442695, %v1683_v6  ;;  %v2800_v8 = vpop.eup %2799 }
 0x52b   : > { %v1174_v10 = vsel %vm391_vm2, %v2800_v8, 0.0  ;;  %v827_v17 = vpop.permute.xlu0 %826 }
 0x52c   : > { %2805 = vpow2.f32 %v1684_v7 }
 0x52e   : > { %v3634_v9 = vpop.eup %2801 }
 0x52f   : > { %v1342_v13 = vsel %vm391_vm2, %v3634_v9, 0.0 }
 0x532   : > { %v3637_v11 = vpop.eup %2803 }
 0x533   : > { %v1514_v12 = vsel %vm391_vm2, %v3637_v11, 0.0 }
 0x535   : > { %1347 = vrot.lane.b32.xlu1 %v3555_v41, %s3211_s18 }
 0x536   : > { %v3643_v14 = vpop.eup %2805 }
 0x537   : > { %v1686_v15 = vsel %vm391_vm2, %v3643_v14, 0.0 }
 0x53e   : > { %1179 = vrot.lane.b32.xlu0 %v3555_v41, %s3212_s28 }
 0x559   : > { %1175 = vadd.xlane.f32.xlu1 %v1174_v10 }
 0x55d   : > { %1515 = vadd.xlane.f32.xlu1 %v1514_v12  ;;  %1343 = vadd.xlane.f32.xlu0 %v1342_v13 }
 0x561   : > { %1687 = vadd.xlane.f32.xlu1 %v1686_v15 }
 0x572   : > { %1691 = vrot.lane.b32.xlu1 %v3555_v41, %s3213_s23 }
 0x573   : > { %1519 = vrot.lane.b32.xlu0 %v3555_v41, %s3214_s4 }
 0x5a9   : > { %v482_v18 = vpop.xlane.xlu1 %481 }
 0x5aa   : > { %2807 = vrcp.f32 %v482_v18 }
 0x5ad   : > { %v650_v19 = vpop.xlane.xlu0 %649 }
 0x5ae   : > { %2809 = vrcp.f32 %v650_v19 }
 0x5b1   : > { %v823_v20 = vpop.xlane.xlu1 %822 }
 0x5b2   : > { %2811 = vrcp.f32 %v823_v20 }
 0x5b4   : > { %v2808_v21 = vpop.eup %2807 }
 0x5b5   : > { %v484_v22 = vmul.f32 %v2808_v21, %v2792_v52  ;;  %v996_v23 = vpop.xlane.xlu0 %995  ;;  %v1348_v32 = vpop.permute.xlu1 %1347 }
 0x5b6   : > { %2813 = vrcp.f32 %v996_v23 }
 0x5b7   : > { %2539 = vmatmul.mubr.msk.f32.vlgmr.msra.gmra.mrb[4].mxu1 %vm391_vm2, %v484_v22 }
 0x5b8   : > { %v2810_v24 = vpop.eup %2809  ;;  %2547 = vmatpush3.msra.mxu1 %v3621_v38  ;;  %2548 = vmatprep.mubr.msk.f32.mxu1 %vm3203_vm1, %v3202_v36 }
 0x5b9   : > { %v652_v41 = vmul.f32 %v2810_v24, %v2794_v54  ;;  %2556 = vmatprep.subr.mxu1 %v3202_v36  ;;  %v1180_v31 = vpop.permute.xlu0 %1179 }
 0x5bb   : > { %2549 = vmatmul.mubr.msk.f32.vlgmr.msra.gmra.mrb[6].mxu1 %vm391_vm2, %v652_v41 }
 0x5bc   : > { %v2812_v25 = vpop.eup %2811  ;;  %2557 = vmatpush3.msra.mxu1 %v827_v17  ;;  %2558 = vmatprep.mubr.msk.f32.mxu1 %vm3203_vm1, %v3202_v36 }
 0x5bd   : > { %v825_v27 = vmul.f32 %v2812_v25, %v2796_v56  ;;  %2566 = vmatprep.subr.mxu1 %v3202_v36  ;;  %v1775_v56 = vld [vmem:[%s1774_s8] sm:$0xff] }
 0x5be   : > { %v2682_v59 = vpack.c.bf16 %v1776_v57, %v1775_v56  ;;  %v2031_v56 = vld [vmem:[%s2029_s25 + $0x8] sm:$0xff] }
 0x5bf   : > { %2559 = vmatmul.mubr.msk.f32.vlgmr.msra.gmra.mrb[8].mxu1 %vm391_vm2, %v825_v27 }
 0x5c0   : > { %v2814_v28 = vpop.eup %2813  ;;  %2567 = vmatpush3.msra.mxu1 %v1000_v16  ;;  %2568 = vmatprep.mubr.msk.f32.mxu1 %vm3203_vm1, %v3202_v36 }
 0x5c1   : > { %v998_v30 = vmul.f32 %v2814_v28, %v3626_v58  ;;  %2576 = vmatprep.subr.mxu1 %v3202_v36  ;;  %2683 = vmatprep.subr.bf16.mxu0 %v2682_v59 }
 0x5c2   : > { %2685 = vmatpush3.bf16.msra.mxu0 %v2682_v59  ;;  %v2033_v59 = vld [vmem:[%s2029_s25 + $0x18] sm:$0xff] }
 0x5c3   : > { %2569 = vmatmul.mubr.msk.f32.vlgmr.msra.gmra.mrb[10].mxu1 %vm391_vm2, %v998_v30  ;;  %2687 = vmatprep.subr.bf16.mxu0 %v2686_v63 }
 0x5c4   : > { %2577 = vmatpush3.msra.mxu1 %v1180_v31  ;;  %2578 = vmatprep.mubr.msk.f32.mxu1 %vm3203_vm1, %v3202_v36 }
 0x5c5   : > { %2586 = vmatprep.subr.mxu1 %v3202_v36 }
 0x5c6   : > { %2689 = vmatpush3.bf16.msra.mxu0 %v2686_v63  ;;  %v2706_v63 = vpack.c.bf16 %v2035_v62, %v2034_v61  ;;  %v2181_v61 = vld [vmem:[%s3787_s16] sm:$0xff] (%p286_p6)  ;;  %v2182_v62 = vld [vmem:[%s3787_s16 + $0x8] sm:$0xff] (%p286_p6) }
 0x5e6   : > { %v1176_v33 = vpop.xlane.xlu1 %1175 }
 0x5e7   : > { %2815 = vrcp.f32 %v1176_v33  ;;  %v1918_v33 = vld [vmem:[%s1916_s22 + $0x8] sm:$0xff] }
 0x5ea   : > { %v1516_v34 = vpop.xlane.xlu1 %1515  ;;  %v1344_v35 = vpop.xlane.xlu0 %1343 }
 0x5eb   : > { %2817 = vrcp.f32 %v1344_v35 }
 0x5ec   : > { %2819 = vrcp.f32 %v1516_v34  ;;  %v1919_v34 = vld [vmem:[%s1916_s22 + $0x10] sm:$0xff] }
 0x5ee   : > { %v1688_v37 = vpop.xlane.xlu1 %1687  ;;  %v1520_v45 = vpop.permute.xlu0 %1519 }
 0x5ef   : > { %2821 = vrcp.f32 %v1688_v37  ;;  %v1920_v37 = vld [vmem:[%s1916_s22 + $0x18] sm:$0xff] }
 0x5f1   : > { %v2816_v38 = vpop.eup %2815 }
 0x5f2   : > { %v1178_v39 = vmul.f32 %v2816_v38, %v2800_v8  ;;  %v1692_v48 = vpop.permute.xlu1 %1691  ;;  %v2694_v38 = vpack.c.bf16 %v1920_v37, %v1919_v34 }
 0x5f4   : > { %2579 = vmatmul.mubr.msk.f32.vlgmr.msra.gmra.mrb[12].mxu1 %vm391_vm2, %v1178_v39 }
 0x5f5   : > { %2587 = vmatpush3.msra.mxu1 %v1348_v32  ;;  %2588 = vmatprep.mubr.msk.f32.mxu1 %vm3203_vm1, %v3202_v36  ;;  %v2818_v42 = vpop.eup %2817 }
 0x5f6   : > { %2596 = vmatprep.subr.mxu1 %v3202_v36  ;;  %v1346_v43 = vmul.f32 %v2818_v42, %v3634_v9  ;;  %v2820_v44 = vpop.eup %2819 }
 0x5f7   : > { %v1518_v46 = vmul.f32 %v2820_v44, %v3637_v11 }
 0x5f8   : > { %2589 = vmatmul.mubr.msk.f32.vlgmr.msra.gmra.mrb[14].mxu1 %vm391_vm2, %v1346_v43 }
 0x5f9   : > { %2597 = vmatpush3.msra.mxu1 %v1520_v45  ;;  %2598 = vmatprep.mubr.msk.f32.mxu1 %vm3203_vm1, %v3202_v36  ;;  %v2822_v47 = vpop.eup %2821 }
 0x5fa   : > { %2606 = vmatprep.subr.mxu1 %v3202_v36  ;;  %v1690_v49 = vmul.f32 %v2822_v47, %v3643_v14  ;;  %v2432_v14 = vld [vmem:[%s1779_s9] ss:$0 sm:$0xff] }
 0x5fc   : > { %2599 = vmatmul.mubr.msk.f32.vlgmr.msra.gmra.mrb[16].mxu1 %vm391_vm2, %v1518_v46 }
 0x5fd   : > { %2607 = vmatpush3.msra.mxu1 %v1692_v48  ;;  %2608 = vmatprep.mubr.msk.f32.mxu1 %vm3203_vm1, %v3202_v36  ;;  %v2435_v48 = vld [vmem:[%s1870_s30] ss:$0 sm:$0xff] }
 0x600   : > { %2609 = vmatmul.mubr.msk.f32.vlgmr.msra.gmra.mrb[18].mxu1 %vm391_vm2, %v1690_v49 }
 0x68a   : > { %v557_v50 = vpop.f32.mrb[4].mxu1 }
 0x68b   : > { %561 = vst.msk [vmem:[#allocation2] sm:$0xff] %vm391_vm2, %v557_v50  ;;  %v2540_v51 = vpop.f32.mrb[5].mxu1  ;;  %v2436_v50 = vld [vmem:[%s1872_s24] ss:$0 sm:$0xff] }
 0x68e   : > { %v725_v52 = vpop.f32.mrb[6].mxu1 }
 0x68f   : > { %730 = vrot.lane.b32.xlu0 %v725_v52, %s3215_s0  ;;  %v2550_v53 = vpop.f32.mrb[7].mxu1 }
 0x692   : > { %v898_v40 = vpop.f32.mrb[8].mxu1 }
 0x693   : > { %903 = vrot.lane.b32.xlu1 %v898_v40, %s3216_s2  ;;  %v2560_v54 = vpop.f32.mrb[9].mxu1 }
 0x696   : > { %v1071_v55 = vpop.f32.mrb[10].mxu1 }
 0x697   : > { %1076 = vrot.lane.b32.xlu1 %v1071_v55, %s3217_s27  ;;  %v2570_v36 = vpop.f32.mrb[11].mxu1 }
 0x698   : > { %v2030_v36 = vld [vmem:[%s2029_s25] sm:$0xff] }
 0x699   : > { %v2698_v57 = vpack.c.bf16 %v2031_v56, %v2030_v36  ;;  %v2445_v36 = vld [vmem:[%s2132_s13] ss:$0 sm:$0xff] }
 0x69b   : > { %2699 = vmatprep.subr.bf16.mxu0 %v2698_v57 }
 0x6c7   : > { %v1251_v58 = vpop.f32.mrb[12].mxu1 }
 0x6c8   : > { %1255 = vst.msk [vmem:[#allocation2 + $0x8] sm:$0xff] %vm391_vm2, %v1251_v58  ;;  %v2580_v60 = vpop.f32.mrb[13].mxu1  ;;  %v2032_v58 = vld [vmem:[%s2029_s25 + $0x10] sm:$0xff] }
 0x6c9   : > { %v2702_v60 = vpack.c.bf16 %v2033_v59, %v2032_v58 }
 0x6cb   : > { %v1419_v0 = vpop.f32.mrb[14].mxu1 }
 0x6cc   : > { %1424 = vrot.lane.b32.xlu0 %v1419_v0, %s3215_s0  ;;  %v2590_v1 = vpop.f32.mrb[15].mxu1  ;;  %v2036_v0 = vld [vmem:[%s2029_s25 + $0x30] sm:$0xff] }
 0x6cd   : > { %v2037_v1 = vld [vmem:[%s2029_s25 + $0x38] sm:$0xff] }
 0x6cf   : > { %v1591_v2 = vpop.f32.mrb[16].mxu1 }
 0x6d0   : > { %1596 = vrot.lane.b32.xlu0 %v1591_v2, %s3216_s2  ;;  %v2600_v3 = vpop.f32.mrb[17].mxu1  ;;  %v2710_v2 = vpack.c.bf16 %v2037_v1, %v2036_v0  ;;  %v3218_v0 = vmov (%p286_p6), 0.0|0.0   ;;  %v2715_v1 = vpack.c.bf16 (%p286_p6), %v2182_v62, %v2181_v61 }
 0x6d1   : > { %v2437_v3 = vld [vmem:[%s1921_s15] ss:$0 sm:$0xff] }
 0x6d3   : > { %v1763_v4 = vpop.f32.mrb[18].mxu1 }
 0x6d4   : > { %1768 = vrot.lane.b32.xlu1 %v1763_v4, %s3217_s27  ;;  %v2610_v5 = vpop.f32.mrb[19].mxu1 }
 0x701   : > { %v731_v6 = vpop.permute.xlu0 %730 }
 0x702   : > { %734 = vst.msk [vmem:[#allocation2] sm:$0xff] %vm733_vm3, %v731_v6 }
 0x705   : > { %v904_v7 = vpop.permute.xlu1 %903 }
 0x706   : > { %907 = vst.msk [vmem:[#allocation2] sm:$0xff] %vm906_vm4, %v904_v7 }
 0x709   : > { %v1077_v8 = vpop.permute.xlu1 %1076 }
 0x70a   : > { %1080 = vst.msk [vmem:[#allocation2] sm:$0xff] %vm1079_vm5, %v1077_v8 }
 0x711   : > { %v1772_v9 = vld [vmem:[#allocation2] sm:$0xff] }
 0x712   : > { %2619 = vmatprep.mubr.msk.f32.mxu0 %vm240_vm0, %v1772_v9 }
 0x73e   : > { %v1425_v10 = vpop.permute.xlu0 %1424 }
 0x73f   : > { %1427 = vst.msk [vmem:[#allocation2 + $0x8] sm:$0xff] %vm733_vm3, %v1425_v10 }
 0x742   : > { %v1597_v11 = vpop.permute.xlu0 %1596 }
 0x743   : > { %1599 = vst.msk [vmem:[#allocation2 + $0x8] sm:$0xff] %vm906_vm4, %v1597_v11 }
 0x746   : > { %v1769_v12 = vpop.permute.xlu1 %1768 }
 0x747   : > { %1771 = vst.msk [vmem:[#allocation2 + $0x8] sm:$0xff] %vm1079_vm5, %v1769_v12 }
 0x74e   : > { %v1773_v13 = vld [vmem:[#allocation2 + $0x8] sm:$0xff] }
 0x74f   : > { %2620 = vmatmul.mubr.msk.f32.vlgmr.msra.gmra.mrb[14].mxu0 %vm240_vm0, %v1773_v13 }
 0x750   : > { %2701 = vmatpush3.bf16.msra.mxu0 %v2698_v57 }
 0x751   : > { %2703 = vmatprep.subr.bf16.mxu0 %v2702_v60 }
 0x754   : > { %2705 = vmatpush3.bf16.msra.mxu0 %v2702_v60 }
 0x755   : > { %2707 = vmatprep.subr.bf16.mxu0 %v2706_v63 }
 0x758   : > { %2709 = vmatpush3.bf16.msra.mxu0 %v2706_v63  ;;  %v2183_v63 = vld [vmem:[%s3787_s16 + $0x10] sm:$0xff] (%p286_p6) }
 0x759   : > { %2711 = vmatprep.subr.bf16.mxu0 %v2710_v2 }
 0x75c   : > { %2713 = vmatpush3.bf16.msra.mxu0 %v2710_v2  ;;  %v2184_v2 = vld [vmem:[%s3787_s16 + $0x18] sm:$0xff] (%p286_p6) }
 0x75d   :  { %2714 = vmatprep.subr.bf16.mxu0 (%p286_p6), %v3218_v0 }
 0x822   : > { %v2621_v15 = vpop.f32.mrb[14].mxu0 }
 0x823   : > { %v1865_v16 = vadd.f32 %v2621_v15, %v2432_v14  ;;  %v1859_v17 = vpop.f32.mrb[15].mxu0 }
 0x824   : > { %v1860_v18 = vadd.f32 %v2432_v14, %v1859_v17 }
 0x825   : > { %v1869_v19 = vadd.f32 %v3175_v29, %v1865_v16  ;;  %v1917_v29 = vld [vmem:[%s1916_s22] sm:$0xff]  ;;  %s3221_s22 = smov (%p286_p6), [#allocation24]  }
 0x826   : > { %v1868_v20 = vadd.f32 %v3179_v26, %v1860_v18  ;;  %v2690_v35 = vpack.c.bf16 %v1918_v33, %v1917_v29  ;;  %s2358_s30 = sshll.u32 (%p286_p6), %s3221_s22, 4  ;;  %s2359_s30 = int_to_ptr.vmem [resolvable:$true] %s2358_s30 }
 0x827   : > { %v1877_v21 = vsel %vm240_vm0, %v1869_v19, 0.0  ;;  %s3123_s24 = scalar_lea.vmem (%p286_p6), %s2359_s30, 32  ;;  %p3128_p8 = scmp.lt.s32.totalorder (%p286_p6), %s2359_s30, %s2359_s30 }
 0x828   : > { %1878 = vadd.xlane.f32.xlu1 %v1877_v21  ;;  %v1874_v22 = vsel %vm240_vm0, %v1868_v20, 0.0  ;;  %2691 = vmatprep.subr.bf16.mxu1 %v2690_v35  ;;  %p3124_p7 = scmp.ne.s32.totalorder (%p286_p6), %s2359_s30, %s3123_s24  ;;  %p3129_p9 = scmp.lt.s32.totalorder (%p286_p6), %s3123_s24, %s3123_s24 }
 0x829   : > { %1875 = vadd.xlane.f32.xlu0 %v1874_v22  ;;  %2693 = vmatpush3.bf16.msra.mxu1 %v2690_v35 }
 0x82a   : > { %2695 = vmatprep.subr.bf16.mxu1 %v2694_v38  ;;  %p3130_p10 = por (%p286_p6), %p3129_p9, %p3128_p8 }
 0x82c   :  { %p3131_p11 = pnand (%p286_p6), %p3130_p10, %p3124_p7 }
 0x82d   : > { %2697 = vmatpush3.bf16.msra.mxu1 %v2694_v38 }
 0x82e   :  { %2720 = vmatprep.subr.bf16.mxu1 (%p286_p6), %v3218_v0 }
 0x8b5   : > { %v1879_v23 = vpop.xlane.xlu1 %1878 }
 0x8b6   : > { %v1881_v24 = vmul.f32 0.03125, %v1879_v23  ;;  %v1876_v41 = vpop.xlane.xlu0 %1875 }
 0x8b7   : > { %v1880_v25 = vmul.f32 0.03125, %v1876_v41 }
 0x8b8   : > { %v1883_v27 = vsub.f32 %v1869_v19, %v1881_v24 }
 0x8b9   : > { %v1882_v28 = vsub.f32 %v1868_v20, %v1880_v25  ;;  %v2441_v25 = vld [vmem:[%s2038_s19] ss:$0 sm:$0xff] }
 0x8ba   : > { %v1885_v32 = vmul.f32 %v1883_v27, %v1883_v27 }
 0x8bb   : > { %v1884_v30 = vmul.f32 %v1882_v28, %v1882_v28 }
 0x8bc   : > { %v1889_v26 = vsel %vm240_vm0, %v1885_v32, 0.0 }
 0x8bd   : > { %v1886_v31 = vsel %vm240_vm0, %v1884_v30, 0.0 }
 0x8be   : > { %1887 = vadd.xlane.f32.xlu0 %v1886_v31 }
 0x8c2   : > { %1890 = vadd.xlane.f32.xlu0 %v1889_v26 }
 0x94b   : > { %v1888_v39 = vpop.xlane.xlu0 %1887 }
 0x94c   : > { %v1892_v42 = vmul.f32 0.03125, %v1888_v39 }
 0x94e   : > { %v1894_v43 = vadd.f32 1e-12, %v1892_v42 }
 0x94f   : > { %v1891_v44 = vpop.xlane.xlu0 %1890 }
 0x950   : > { %2823 = vrsqrt.f32 %v1894_v43  ;;  %v1893_v45 = vmul.f32 0.03125, %v1891_v44 }
 0x952   : > { %v1895_v46 = vadd.f32 1e-12, %v1893_v45 }
 0x954   : > { %2825 = vrsqrt.f32 %v1895_v46 }
 0x95a   : > { %v2824_v47 = vpop.eup %2823 }
 0x95b   : > { %v1898_v49 = vmul.f32 %v2824_v47, %v1882_v28 }
 0x95d   : > { %v1906_v51 = vmul.f32 %v2435_v48, %v1898_v49 }
 0x95e   : > { %v2826_v52 = vpop.eup %2825 }
 0x95f   : > { %v1899_v53 = vmul.f32 %v2826_v52, %v1883_v27  ;;  %v3705_v40 = vadd.f32 %v2436_v50, %v1906_v51 }
 0x961   : > { %v1907_v54 = vmul.f32 %v2435_v48, %v1899_v53  ;;  %2630 = vmatprep.mubr.msk.f32.mxu1 %vm240_vm0, %v3705_v40 }
 0x963   : > { %v1915_v55 = vadd.f32 %v2436_v50, %v1907_v54 }
 0x965   : > { %2631 = vmatmul.mubr.msk.f32.vlgmr.msra.gmra.mrb[20].mxu1 %vm240_vm0, %v1915_v55 }
 0xa38   : > { %v2632_v4 = vpop.f32.mrb[20].mxu1 }
 0xa39   : > { %v2007_v5 = vadd.f32 %v2632_v4, %v2437_v3  ;;  %v2001_v6 = vpop.f32.mrb[21].mxu1  ;;  %v2718_v4 = vpack.c.bf16 (%p286_p6), %v2184_v2, %v2183_v63 }
 0xa3a   : > { %v2002_v7 = vadd.f32 %v2437_v3, %v2001_v6  ;;  %v3220_v3 = vmov (%p286_p6), 0.0  }
 0xa3b   : > { %v2013_v8 = vmul.f32 0.044715, %v2007_v5  ;;  %v2011_v23 = vmul.f32 0.5, %v2007_v5  ;;  %2671 = vmatprep.mubr.msk.f32.mxu1 (%p286_p6), %vm3219_vm7, %v3220_v3 }
 0xa3c   : > { %v2012_v9 = vmul.f32 0.044715, %v2002_v7  ;;  %v2010_v21 = vmul.f32 0.5, %v2002_v7 }
 0xa3d   : > { %v2015_v10 = vmul.f32 %v2013_v8, %v2007_v5  ;;  %v2267_v8 = vld [vmem:[%s3813_s12 + $0x8] sm:$0xff] (%p286_p6) }
 0xa3e   : > { %v2014_v11 = vmul.f32 %v2012_v9, %v2002_v7  ;;  %v2268_v9 = vld [vmem:[%s3813_s12 + $0x10] sm:$0xff] (%p286_p6) }
 0xa3f   : > { %v2017_v12 = vmul.f32 %v2015_v10, %v2007_v5 }
 0xa40   : > { %v2016_v13 = vmul.f32 %v2014_v11, %v2002_v7  ;;  %v2269_v11 = vld [vmem:[%s3813_s12 + $0x18] sm:$0xff] (%p286_p6) }
 0xa41   : > { %v2019_v14 = vadd.f32 %v2017_v12, %v2007_v5  ;;  %v2724_v12 = vpack.c.bf16 (%p286_p6), %v2269_v11, %v2268_v9 }
 0xa42   : > { %v2018_v15 = vadd.f32 %v2016_v13, %v2002_v7  ;;  %v2266_v7 = vld [vmem:[%s3813_s12] sm:$0xff] (%p286_p6)  ;;  %v2446_v13 = vld [vmem:[#allocation23] ss:$0 sm:$0xff] (%p286_p6) }
 0xa43   : > { %v2021_v16 = vmul.f32 0.7978846, %v2019_v14  ;;  %v2721_v10 = vpack.c.bf16 (%p286_p6), %v2267_v8, %v2266_v7 }
 0xa44   : > { %v2020_v17 = vmul.f32 0.7978846, %v2018_v15 }
 0xa45   : > { %2827 = vtanh.f32 %v2021_v16  ;;  %2722 = vmatpush3.bf16.msra.mxu1 (%p286_p6), %v2721_v10 }
 0xa46   : > { %2829 = vtanh.f32 %v2020_v17  ;;  %2723 = vmatprep.subr.bf16.mxu1 (%p286_p6), %v3218_v0 }
 0xa49   :  { %2725 = vmatpush3.bf16.msra.mxu1 (%p286_p6), %v2724_v12 }
 0xa4f   : > { %v2828_v18 = vpop.eup %2827 }
 0xa50   : > { %v2830_v19 = vpop.eup %2829  ;;  %v2025_v20 = vadd.f32 1.0, %v2828_v18  ;;  %v2448_v18 = vld [vmem:[%s3814_s29] ss:$0 sm:$0xff] (%p286_p6) }
 0xa51   : > { %v2024_v22 = vadd.f32 1.0, %v2830_v19 }
 0xa52   : > { %v2027_v41 = vmul.f32 %v2025_v20, %v2011_v23 }
 0xa53   : > { %v2026_v24 = vmul.f32 %v2024_v22, %v2010_v21 }
 0xa55   : > { %2649 = vmatprep.mubr.msk.f32.mxu0 %vm2046_vm6, %v2026_v24 }
 0xa56   : > { %2650 = vmatmul.mubr.msk.f32.vlgmr.msra.gmra.mrb[16].mxu0 %vm2046_vm6, %v2027_v41 }
 0xa57   :  { %2660 = vmatprep.mubr.msk.f32.mxu0 (%p286_p6), %vm3219_vm7, %v3220_v3  ;;  %2716 = vmatpush3.bf16.msra.mxu0 (%p286_p6), %v2715_v1 }
 0xa58   :  { %2717 = vmatprep.subr.bf16.mxu0 (%p286_p6), %v3218_v0 }
 0xa5b   :  { %2719 = vmatpush3.bf16.msra.mxu0 (%p286_p6), %v2718_v4 }
 0xb29   : > { %v2651_v27 = vpop.f32.mrb[16].mxu0 }
 0xb2a   : > { %v2125_v28 = vadd.f32 %v2651_v27, %v2441_v25  ;;  %v2119_v30 = vpop.f32.mrb[17].mxu0 }
 0xb2b   : > { %v2120_v31 = vadd.f32 %v2441_v25, %v2119_v30 }
 0xb2c   : > { %v2129_v32 = vadd.f32 %v2125_v28, %v1915_v55 }
 0xb2d   : > { %v2128_v26 = vadd.f32 %v2120_v31, %v3705_v40  ;;  %v2444_v40 = vld [vmem:[%s2130_s5] ss:$0 sm:$0xff] }
 0xb2e   : > { %v2137_v29 = vsel %vm240_vm0, %v2129_v32, 0.0 }
 0xb2f   : > { %2138 = vadd.xlane.f32.xlu0 %v2137_v29  ;;  %v2134_v33 = vsel %vm240_vm0, %v2128_v26, 0.0 }
 0xb30   : > { %2135 = vadd.xlane.f32.xlu1 %v2134_v33 }
 0xbbc   : > { %v2139_v34 = vpop.xlane.xlu0 %2138 }
 0xbbd   : > { %v2141_v35 = vmul.f32 0.03125, %v2139_v34  ;;  %v2136_v37 = vpop.xlane.xlu1 %2135 }
 0xbbe   : > { %v2140_v38 = vmul.f32 0.03125, %v2136_v37 }
 0xbbf   : > { %v2143_v39 = vsub.f32 %v2129_v32, %v2141_v35 }
 0xbc0   : > { %v2142_v42 = vsub.f32 %v2128_v26, %v2140_v38 }
 0xbc1   : > { %v2145_v43 = vmul.f32 %v2143_v39, %v2143_v39 }
 0xbc2   : > { %v2144_v44 = vmul.f32 %v2142_v42, %v2142_v42 }
 0xbc3   : > { %v2149_v45 = vsel %vm240_vm0, %v2145_v43, 0.0 }
 0xbc4   : > { %2150 = vadd.xlane.f32.xlu0 %v2149_v45  ;;  %v2146_v46 = vsel %vm240_vm0, %v2144_v44, 0.0 }
 0xbc5   : > { %2147 = vadd.xlane.f32.xlu1 %v2146_v46 }
 0xc51   : > { %v2151_v47 = vpop.xlane.xlu0 %2150 }
 0xc52   : > { %v2153_v48 = vmul.f32 0.03125, %v2151_v47  ;;  %v2148_v49 = vpop.xlane.xlu1 %2147 }
 0xc53   : > { %v2152_v50 = vmul.f32 0.03125, %v2148_v49 }
 0xc54   : > { %v2155_v51 = vadd.f32 1e-12, %v2153_v48 }
 0xc55   : > { %v2154_v52 = vadd.f32 1e-12, %v2152_v50 }
 0xc56   : > { %2831 = vrsqrt.f32 %v2155_v51 }
 0xc57   : > { %2833 = vrsqrt.f32 %v2154_v52 }
 0xc60   : > { %v2832_v53 = vpop.eup %2831 }
 0xc61   : > { %v2834_v54 = vpop.eup %2833  ;;  %v2159_v55 = vmul.f32 %v2832_v53, %v2143_v39 }
 0xc62   : > { %v2158_v56 = vmul.f32 %v2834_v54, %v2142_v42  ;;  %288 = sbr.rel (!%p286_p6) target bundleno = 582 (0x246), region = 172 }
 0xc63   : > { %v2167_v57 = vmul.f32 %v2444_v40, %v2159_v55 }
 0xc64   : > { %v2166_v58 = vmul.f32 %v2444_v40, %v2158_v56 }
 0xc65   : > { %v2175_v59 = vadd.f32 %v2445_v36, %v2167_v57  }
 0xc66   : > { %v2174_v60 = vadd.f32 %v2445_v36, %v2166_v58  }
 0xc67   : > { %v3811_v29 = vmov %v2175_v59  ;;  %v2177_v5 = vrot.slane (%p286_p6), %v2175_v59, 7 }
 0xc68   : > { %v3812_v26 = vmov %v2174_v60 }
 0xc69   :  { %v2180_v6 = vsel %vm2179_vm8, %v2174_v60, %v2177_v5 }
 0xc6a   :  { %2661 = vmatmul.mubr.msk.f32.vlgmr.msra.gmra.mrb[0].mxu0 %vm240_vm0, %v2180_v6 }
 0xd3d   :  { %v2261_v14 = vpop.f32.mrb[0].mxu0 }
 0xd3e   :  { %v2262_v15 = vadd.f32 %v2446_v13, %v2261_v14  ;;  %v2662_v16 = vpop.f32.mrb[1].mxu0 }
 0xd40   :  { %2835 = vtanh.f32 %v2262_v15 }
 0xd4a   :  { %v2836_v17 = vpop.eup %2835 }
 0xd4b   :  { %2672 = vmatmul.mubr.msk.f32.vlgmr.msra.gmra.mrb[0].mxu1 %vm240_vm0, %v2836_v17 }
 0xe1e   :  { %v2346_v19 = vpop.f32.mrb[0].mxu1 }
 0xe1f   :  { %v2347_v20 = vadd.f32 %v2448_v18, %v2346_v19  ;;  %v2673_v21 = vpop.f32.mrb[1].mxu1 }
 0xe21   :  { %2351 = vst.msk [vmem:[#allocation24] sm:$0x3] %vm2350_vm9, %v2347_v20 }
 0xe22   :  { %3134 = shalt.err (!%p3131_p11)
}
 0xe23   :  { %s3815_s7 = sld [smem:[#allocation40_spill]] }
 0xe29   :  { %s3135_s25 = scalar_lea.hbm %s3815_s7, 32 }
 0xe2a   :  { %p3136_p12 = scmp.ne.s32.totalorder %s3815_s7, %s3135_s25  ;;  %p3139_p13 = scmp.lt.u32.totalorder %s3135_s25, %s3815_s7 }
 0xe2c   :  { %p3141_p0 = pnand %p3139_p13, %p3136_p12 }
 0xe2e   :  { %3144 = shalt.err (!%p3141_p0)
}
 0xe2f   :  { %2361 = dma.vmem_to_hbm [thread:$0]  %s2359_s30, 32, %s3815_s7, [#allocation5]  }
 0xe30   :  { %3171 = dma.done.wait [#allocation5], 32  }
 0xe31   :  { %3172 = vsyncadd [#allocation5], 4294967264 }
 0xe32   :  { %2365 = vsyncpa [#allocation4], 1 }
 0xe33   :  { %2366 = vsyncpa [#allocation7], 1 }
 0xe34   :  { %2367 = vsyncpa [#allocation10], 1 }
 0xe35   :  { %2368 = vsyncpa [#allocation13], 1 }
 0xe36   :  { %2369 = vsyncpa [#allocation16], 1 }
 0xe37   :  { %2370 = vsyncpa [#allocation19], 1 }
 0xe38   :  { %2371 = vsyncpa [#allocation22], 1 }
 0xe39   :  { %2372 = vsyncpa [#allocation5], 1 }

</bundles_post_ra>
